<compile_context>
chip_gen: v5e
topology: v5e:2x2
jax: 0.10.0
libtpu: 0.0.40
codegen_flags: <defaults>
</compile_context>

<pallas_src>
import jax
import jax.numpy as jnp
from jax.experimental import pallas as pl
from jax.experimental.pallas import tpu as pltpu

LANE = 128
SUBLANE = 8


def sae_kernel(x_ref, w1_ref, b1_ref, w2_ref, b2_ref,
               w3_ref, b3_ref, w4_ref, b4_ref, o_ref):
    x = x_ref[...]
    # fc1 + sigmoid
    h = jnp.dot(x, w1_ref[...], preferred_element_type=jnp.float32) + b1_ref[...]
    h = jax.nn.sigmoid(h)
    # fc2 + sigmoid
    h = jnp.dot(h, w2_ref[...], preferred_element_type=jnp.float32) + b2_ref[...]
    h = jax.nn.sigmoid(h)
    # fc3 + sigmoid
    h = jnp.dot(h, w3_ref[...], preferred_element_type=jnp.float32) + b3_ref[...]
    h = jax.nn.sigmoid(h)
    # fc4 (no activation)
    out = jnp.dot(h, w4_ref[...], preferred_element_type=jnp.float32) + b4_ref[...]
    o_ref[...] = out.astype(o_ref.dtype)


def _round_up(n, m):
    return ((n + m - 1) // m) * m


def _pad_to(a, shape):
    pads = [(0, t - s) for s, t in zip(a.shape, shape)]
    if all(p == (0, 0) for p in pads):
        return a
    return jnp.pad(a, pads)


def _vmem_plan(f_pad, h_pad, batch):
    """Pick (tb, vmem_limit_bytes) from this generation's physical VMEM."""
    try:
        phys = int(pltpu.get_tpu_info().vmem_capacity_bytes)  # 128 MiB v5e/v6e, 64 MiB v7x
    except Exception:
        phys = 64 << 20  # conservative default: v7x-class VMEM
    # Scoped limit we request: leave ~16 MiB headroom for compiler scratch.
    vmem_limit = min(max(phys - (16 << 20), 32 << 20), 100 << 20)

    f32 = 4
    # Resident params; budget 2 pipeline buffers each (default double-buffering).
    param_elems = (2 * f_pad * h_pad        # W1, W4
                   + 2 * h_pad * h_pad      # W2, W3
                   + 3 * h_pad + f_pad)     # biases
    param_bytes = 2 * f32 * param_elems
    # Streaming bytes per batch row: x tile + out tile (double-buffered) plus
    # in-kernel hidden activations.
    per_row = (2 * 2 * f_pad + 4 * h_pad) * f32

    budget = vmem_limit - param_bytes - (4 << 20)
    tb = max(SUBLANE, budget // per_row)
    tb = min(tb, 1024)  # diminishing returns past ~1K rows per step
    if batch >= 2 * SUBLANE:
        # Keep >= 2 grid steps so both v7x TensorCores get work.
        tb = min(tb, _round_up((batch + 1) // 2, SUBLANE))
    tb = min(tb, _round_up(batch, SUBLANE))
    tb = max(SUBLANE, (tb // SUBLANE) * SUBLANE)
    return int(tb), int(vmem_limit)


def sae_forward(x, params, *, tb=None):
    """x: (B, nb_movies) float32. params: dict of weights (in,out) and biases (1,out)."""
    B, nb_movies = x.shape
    h_pad = LANE                          # pad 20/10/20 hidden dims to one lane width
    f_pad = _round_up(nb_movies, LANE)    # lane-align the feature/output dim

    # Zero-pad params so every matmul operand is lane-dense. Padded hidden
    # lanes become sigmoid(0)=0.5 but hit zero rows of the next weight, so the
    # math is unchanged; padded output columns are sliced off below.
    w1 = _pad_to(params["w1"], (f_pad, h_pad))
    b1 = _pad_to(params["b1"], (1, h_pad))
    w2 = _pad_to(params["w2"], (h_pad, h_pad))
    b2 = _pad_to(params["b2"], (1, h_pad))
    w3 = _pad_to(params["w3"], (h_pad, h_pad))
    b3 = _pad_to(params["b3"], (1, h_pad))
    w4 = _pad_to(params["w4"], (h_pad, f_pad))
    b4 = _pad_to(params["b4"], (1, f_pad))
    xp = _pad_to(x, (B, f_pad))

    auto_tb, vmem_limit = _vmem_plan(f_pad, h_pad, B)
    if tb is None:
        tb = auto_tb
    tb = max(SUBLANE, min(int(tb), _round_up(B, SUBLANE)))

    def resident(shape):
        # Whole-array block, constant index across the grid -> stays in VMEM.
        return pl.BlockSpec(shape, lambda i: (0,) * len(shape))

    out = pl.pallas_call(
        sae_kernel,
        out_shape=jax.ShapeDtypeStruct((B, f_pad), jnp.float32),
        grid=(pl.cdiv(B, tb),),
        in_specs=[
            pl.BlockSpec((tb, f_pad), lambda i: (i, 0)),  # x tile
            resident(w1.shape), resident(b1.shape),
            resident(w2.shape), resident(b2.shape),
            resident(w3.shape), resident(b3.shape),
            resident(w4.shape), resident(b4.shape),
        ],
        out_specs=pl.BlockSpec((tb, f_pad), lambda i: (i, 0)),
        compiler_params=pltpu.CompilerParams(
            dimension_semantics=("parallel",),
            vmem_limit_bytes=vmem_limit,
        ),
    )(xp, w1, b1, w2, b2, w3, b3, w4, b4)

    return out[:, :nb_movies] if f_pad != nb_movies else out


def init_params(key, nb_movies):
    """Deterministic init matching nn.Linear shapes (stored transposed: (in, out))."""
    ks = jax.random.split(key, 8)

    def lin(kw, kb, fan_in, fan_out):
        bound = 1.0 / jnp.sqrt(fan_in)
        w = jax.random.uniform(kw, (fan_in, fan_out), jnp.float32, -bound, bound)
        b = jax.random.uniform(kb, (1, fan_out), jnp.float32, -bound, bound)
        return w, b

    w1, b1 = lin(ks[0], ks[1], nb_movies, 20)
    w2, b2 = lin(ks[2], ks[3], 20, 10)
    w3, b3 = lin(ks[4], ks[5], 10, 20)
    w4, b4 = lin(ks[6], ks[7], 20, nb_movies)
    return {"w1": w1, "b1": b1, "w2": w2, "b2": b2,
            "w3": w3, "b3": b3, "w4": w4, "b4": b4}


def sae_ref(x, p):
    h = jax.nn.sigmoid(x @ p["w1"] + p["b1"])
    h = jax.nn.sigmoid(h @ p["w2"] + p["b2"])
    h = jax.nn.sigmoid(h @ p["w3"] + p["b3"])
    return h @ p["w4"] + p["b4"]


if __name__ == "__main__":
    key = jax.random.PRNGKey(0)
    k_x, k_p = jax.random.split(key)

    B = 128          # small batch of users (2 batch tiles in the grid)
    NB_MOVIES = 200  # deliberately not a multiple of 128 -> exercises lane padding

    # synthetic ratings in [0, 5]
    x = jax.random.uniform(k_x, (B, NB_MOVIES), jnp.float32, 0.0, 5.0)
    params = init_params(k_p, NB_MOVIES)

    out = jax.block_until_ready(sae_forward(x, params))

    ref = sae_ref(x, params)
    assert out.shape == (B, NB_MOVIES)
    assert jnp.allclose(out, ref, atol=1e-4, rtol=1e-4)

    print("KERNEL_OK")
</pallas_src>

<mosaic_0001>
module attributes {stable_mosaic.version = 11 : i64} {
  func.func @sae_kernel(%arg0: i32, %arg1: memref<64x256xf32, #tpu.memory_space<vmem>>, %arg2: memref<256x128xf32, #tpu.memory_space<vmem>>, %arg3: memref<1x128xf32, #tpu.memory_space<vmem>>, %arg4: memref<128x128xf32, #tpu.memory_space<vmem>>, %arg5: memref<1x128xf32, #tpu.memory_space<vmem>>, %arg6: memref<128x128xf32, #tpu.memory_space<vmem>>, %arg7: memref<1x128xf32, #tpu.memory_space<vmem>>, %arg8: memref<128x256xf32, #tpu.memory_space<vmem>>, %arg9: memref<1x256xf32, #tpu.memory_space<vmem>>, %arg10: memref<64x256xf32, #tpu.memory_space<vmem>>) attributes {dimension_semantics = [#tpu.dimension_semantics<parallel>], iteration_bounds = array<i64: 2>, scalar_prefetch = 0 : i64, scratch_operands = 0 : i64, tpu.core_type = #tpu.core_type<tc>, window_params = [{transform_indices = @transform_0, window_bounds = array<i64: 64, 256>}, {pipeline_mode = #tpu.pipeline_mode<synchronous>, transform_indices = @transform_1, window_bounds = array<i64: 256, 128>}, {pipeline_mode = #tpu.pipeline_mode<synchronous>, transform_indices = @transform_2, window_bounds = array<i64: 1, 128>}, {pipeline_mode = #tpu.pipeline_mode<synchronous>, transform_indices = @transform_3, window_bounds = array<i64: 128, 128>}, {pipeline_mode = #tpu.pipeline_mode<synchronous>, transform_indices = @transform_4, window_bounds = array<i64: 1, 128>}, {pipeline_mode = #tpu.pipeline_mode<synchronous>, transform_indices = @transform_5, window_bounds = array<i64: 128, 128>}, {pipeline_mode = #tpu.pipeline_mode<synchronous>, transform_indices = @transform_6, window_bounds = array<i64: 1, 128>}, {pipeline_mode = #tpu.pipeline_mode<synchronous>, transform_indices = @transform_7, window_bounds = array<i64: 128, 256>}, {pipeline_mode = #tpu.pipeline_mode<synchronous>, transform_indices = @transform_8, window_bounds = array<i64: 1, 256>}, {transform_indices = @transform_9, window_bounds = array<i64: 64, 256>}]} {
    %c0 = arith.constant 0 : index
    %c0_0 = arith.constant 0 : index
    %0 = vector.load %arg1[%c0, %c0_0] : memref<64x256xf32, #tpu.memory_space<vmem>>, vector<64x256xf32>
    %c0_1 = arith.constant 0 : index
    %c0_2 = arith.constant 0 : index
    %1 = vector.load %arg2[%c0_1, %c0_2] : memref<256x128xf32, #tpu.memory_space<vmem>>, vector<256x128xf32>
    %cst = arith.constant dense<0.000000e+00> : vector<64x128xf32>
    %2 = tpu.matmul %0, %1, %cst {dimension_numbers = #tpu.dot_dimension_numbers<[1], [0], [0], [1], [0, 0, 1, 1], [], []>} : vector<64x256xf32>, vector<256x128xf32>, vector<64x128xf32> -> vector<64x128xf32>
    %c0_3 = arith.constant 0 : index
    %c0_4 = arith.constant 0 : index
    %3 = vector.load %arg3[%c0_3, %c0_4] : memref<1x128xf32, #tpu.memory_space<vmem>>, vector<1x128xf32>
    %4 = vector.broadcast %3 : vector<1x128xf32> to vector<64x128xf32>
    %5 = arith.addf %2, %4 : vector<64x128xf32>
    %6 = arith.negf %5 : vector<64x128xf32>
    %7 = math.exp %6 : vector<64x128xf32>
    %cst_5 = arith.constant 1.000000e+00 : f32
    %8 = vector.broadcast %cst_5 : f32 to vector<64x128xf32>
    %9 = arith.addf %8, %7 : vector<64x128xf32>
    %10 = arith.divf %8, %9 : vector<64x128xf32>
    %c0_6 = arith.constant 0 : index
    %c0_7 = arith.constant 0 : index
    %11 = vector.load %arg4[%c0_6, %c0_7] : memref<128x128xf32, #tpu.memory_space<vmem>>, vector<128x128xf32>
    %cst_8 = arith.constant dense<0.000000e+00> : vector<64x128xf32>
    %12 = tpu.matmul %10, %11, %cst_8 {dimension_numbers = #tpu.dot_dimension_numbers<[1], [0], [0], [1], [0, 0, 1, 1], [], []>} : vector<64x128xf32>, vector<128x128xf32>, vector<64x128xf32> -> vector<64x128xf32>
    %c0_9 = arith.constant 0 : index
    %c0_10 = arith.constant 0 : index
    %13 = vector.load %arg5[%c0_9, %c0_10] : memref<1x128xf32, #tpu.memory_space<vmem>>, vector<1x128xf32>
    %14 = vector.broadcast %13 : vector<1x128xf32> to vector<64x128xf32>
    %15 = arith.addf %12, %14 : vector<64x128xf32>
    %16 = arith.negf %15 : vector<64x128xf32>
    %17 = math.exp %16 : vector<64x128xf32>
    %cst_11 = arith.constant 1.000000e+00 : f32
    %18 = vector.broadcast %cst_11 : f32 to vector<64x128xf32>
    %19 = arith.addf %18, %17 : vector<64x128xf32>
    %20 = arith.divf %18, %19 : vector<64x128xf32>
    %c0_12 = arith.constant 0 : index
    %c0_13 = arith.constant 0 : index
    %21 = vector.load %arg6[%c0_12, %c0_13] : memref<128x128xf32, #tpu.memory_space<vmem>>, vector<128x128xf32>
    %cst_14 = arith.constant dense<0.000000e+00> : vector<64x128xf32>
    %22 = tpu.matmul %20, %21, %cst_14 {dimension_numbers = #tpu.dot_dimension_numbers<[1], [0], [0], [1], [0, 0, 1, 1], [], []>} : vector<64x128xf32>, vector<128x128xf32>, vector<64x128xf32> -> vector<64x128xf32>
    %c0_15 = arith.constant 0 : index
    %c0_16 = arith.constant 0 : index
    %23 = vector.load %arg7[%c0_15, %c0_16] : memref<1x128xf32, #tpu.memory_space<vmem>>, vector<1x128xf32>
    %24 = vector.broadcast %23 : vector<1x128xf32> to vector<64x128xf32>
    %25 = arith.addf %22, %24 : vector<64x128xf32>
    %26 = arith.negf %25 : vector<64x128xf32>
    %27 = math.exp %26 : vector<64x128xf32>
    %cst_17 = arith.constant 1.000000e+00 : f32
    %28 = vector.broadcast %cst_17 : f32 to vector<64x128xf32>
    %29 = arith.addf %28, %27 : vector<64x128xf32>
    %30 = arith.divf %28, %29 : vector<64x128xf32>
    %c0_18 = arith.constant 0 : index
    %c0_19 = arith.constant 0 : index
    %31 = vector.load %arg8[%c0_18, %c0_19] : memref<128x256xf32, #tpu.memory_space<vmem>>, vector<128x256xf32>
    %cst_20 = arith.constant dense<0.000000e+00> : vector<64x256xf32>
    %32 = tpu.matmul %30, %31, %cst_20 {dimension_numbers = #tpu.dot_dimension_numbers<[1], [0], [0], [1], [0, 0, 1, 1], [], []>} : vector<64x128xf32>, vector<128x256xf32>, vector<64x256xf32> -> vector<64x256xf32>
    %c0_21 = arith.constant 0 : index
    %c0_22 = arith.constant 0 : index
    %33 = vector.load %arg9[%c0_21, %c0_22] : memref<1x256xf32, #tpu.memory_space<vmem>>, vector<1x256xf32>
    %34 = vector.broadcast %33 : vector<1x256xf32> to vector<64x256xf32>
    %35 = arith.addf %32, %34 : vector<64x256xf32>
    %c0_23 = arith.constant 0 : index
    %c0_24 = arith.constant 0 : index
    %36 = vector.load %arg10[%c0_23, %c0_24] : memref<64x256xf32, #tpu.memory_space<vmem>>, vector<64x256xf32>
    tpu.vector_store %arg10[%c0_23, %c0_24], %35 {strides = array<i32>} : memref<64x256xf32, #tpu.memory_space<vmem>>, vector<64x256xf32>,
    return
  }
  func.func @transform_0(%arg0: i32) -> (i32, i32) {
    %c0_i32 = arith.constant 0 : i32
    %c0_i32_0 = arith.constant 0 : i32
    return %arg0, %c0_i32 : i32, i32
  }
  func.func @transform_1(%arg0: i32) -> (i32, i32) {
    %c0_i32 = arith.constant 0 : i32
    %c0_i32_0 = arith.constant 0 : i32
    %c0_i32_1 = arith.constant 0 : i32
    return %c0_i32, %c0_i32_0 : i32, i32
  }
  func.func @transform_2(%arg0: i32) -> (i32, i32) {
    %c0_i32 = arith.constant 0 : i32
    %c0_i32_0 = arith.constant 0 : i32
    %c0_i32_1 = arith.constant 0 : i32
    return %c0_i32, %c0_i32_0 : i32, i32
  }
  func.func @transform_3(%arg0: i32) -> (i32, i32) {
    %c0_i32 = arith.constant 0 : i32
    %c0_i32_0 = arith.constant 0 : i32
    %c0_i32_1 = arith.constant 0 : i32
    return %c0_i32, %c0_i32_0 : i32, i32
  }
  func.func @transform_4(%arg0: i32) -> (i32, i32) {
    %c0_i32 = arith.constant 0 : i32
    %c0_i32_0 = arith.constant 0 : i32
    %c0_i32_1 = arith.constant 0 : i32
    return %c0_i32, %c0_i32_0 : i32, i32
  }
  func.func @transform_5(%arg0: i32) -> (i32, i32) {
    %c0_i32 = arith.constant 0 : i32
    %c0_i32_0 = arith.constant 0 : i32
    %c0_i32_1 = arith.constant 0 : i32
    return %c0_i32, %c0_i32_0 : i32, i32
  }
  func.func @transform_6(%arg0: i32) -> (i32, i32) {
    %c0_i32 = arith.constant 0 : i32
    %c0_i32_0 = arith.constant 0 : i32
    %c0_i32_1 = arith.constant 0 : i32
    return %c0_i32, %c0_i32_0 : i32, i32
  }
  func.func @transform_7(%arg0: i32) -> (i32, i32) {
    %c0_i32 = arith.constant 0 : i32
    %c0_i32_0 = arith.constant 0 : i32
    %c0_i32_1 = arith.constant 0 : i32
    return %c0_i32, %c0_i32_0 : i32, i32
  }
  func.func @transform_8(%arg0: i32) -> (i32, i32) {
    %c0_i32 = arith.constant 0 : i32
    %c0_i32_0 = arith.constant 0 : i32
    %c0_i32_1 = arith.constant 0 : i32
    return %c0_i32, %c0_i32_0 : i32, i32
  }
  func.func @transform_9(%arg0: i32) -> (i32, i32) {
    %c0_i32 = arith.constant 0 : i32
    %c0_i32_0 = arith.constant 0 : i32
    return %arg0, %c0_i32 : i32, i32
  }
}

</mosaic_0001>

<bundles_post_ra>
// kernel: tpu_custom_call.1
= control target key start
LH: loop header
LB: loop body
LE: loop exit
PB: predicated region body
PF: predicated region fallthrough
CT: control target
= control target key end

     0   :  { %s2309_s0 = inlined_call_operand.hbm [shape: f32[128,256], index: 0, kind: input, shape index: {}]   ;;  %s2310_s1 = inlined_call_operand.hbm [shape: f32[256,128], index: 1, kind: input, shape index: {}]   ;;  %s2311_s2 = inlined_call_operand.vmem [shape: f32[1,128], index: 2, kind: input, shape index: {}]   ;;  %s2312_s3 = inlined_call_operand.hbm [shape: f32[128,128], index: 3, kind: input, shape index: {}]   ;;  %s2313_s4 = inlined_call_operand.hbm [shape: f32[1,128], index: 4, kind: input, shape index: {}]   ;;  %s2314_s5 = inlined_call_operand.hbm [shape: f32[128,128], index: 5, kind: input, shape index: {}]   ;;  %s2315_s6 = inlined_call_operand.vmem [shape: f32[1,128], index: 6, kind: input, shape index: {}]   ;;  %s2316_s7 = inlined_call_operand.hbm [shape: f32[128,256], index: 7, kind: input, shape index: {}]   ;;  %s2317_s8 = inlined_call_operand.vmem [shape: f32[1,256], index: 8, kind: input, shape index: {}]   ;;  %s2318_s9 = inlined_call_operand.hbm [shape: f32[128,256], index: 9, kind: output, shape index: {}]  }
   0x1   :  { %2321 = sst [smem:[#allocation19_spill]] %s2310_s1 }
   0x2   :  { %2322 = sst [smem:[#allocation20_spill]] %s2312_s3 }
   0x3   :  { %2323 = sst [smem:[#allocation21_spill]] %s2313_s4 }
   0x4   :  { %14 = vsyncpa [#allocation3], 0 }
   0x5   :  { %16 = vsyncpa [#allocation3 + $0x1], 0 }
   0x6   :  { %17 = vsyncpa [#allocation6], 0 }
   0x7   :  { %18 = vsyncpa [#allocation9], 0 }
   0x8   :  { %19 = vsyncpa [#allocation12], 0 }
   0x9   :  { %20 = vsyncpa [#allocation4], 0 }
   0xa   :  { %22 = vsyncpa [#allocation4 + $0x1], 0  ;;  %s2032_s30 = smov 0   ;;  %s2034_s10 = smov 0  }
   0xb   :  { %s2036_s11 = smov 0   ;;  %s2038_s12 = smov 0  }
   0xc LB: > { %s2324_s1 = sld [smem:[#allocation19_spill]]  ;;  %s2056_s16 = sadd.s32 4294967295, %s1969_s12   ;;  %s1969_s12 = sphi %s2038_s12, %s2339_s12   ;;  %s1965_s11 = sphi %s2036_s11, %s2338_s11   ;;  %s1961_s10 = sphi %s2034_s10, %s2337_s10   ;;  %s1957_s30 = sphi %s2032_s30, %s2336_s30  }
   0xd   : > { %p1424_p0 = scmp.ge.s32.totalorder %s1969_s12, 1  ;;  %p49_p1 = scmp.eq.s32.totalorder %s2056_s16, 0 }
   0xe   : > { %p253_p2 = scmp.lt.s32.totalorder %s1969_s12, 3  ;;  %s1971_s18 = smov [#allocation5]  }
   0xf   : > { %s266_s19 = sshll.u32 %s1971_s18, 4  ;;  %s2326_s4 = sld [smem:[#allocation21_spill]]  ;;  %s267_s19 = int_to_ptr.vmem [resolvable:$true] %s266_s19 }
  0x10   : > { %p2061_p3 = pnand %p1424_p0, %p253_p2  ;;  %s2328_s3 = sld [smem:[#allocation20_spill]] }
  0x11   : > { %s1972_s27 = smov [#allocation8]   ;;  %s1973_s29 = smov 128  }
  0x12   : > { %s264_s15 = sshll.u32 %s2324_s1, 4  ;;  %p1533_p4 = pneg %p2061_p3  ;;  %s265_s15 = int_to_ptr.hbm [resolvable:$true] %s264_s15 }
  0x13   : > { %s298_s28 = sshll.u32 %s1972_s27, 4  ;;  %s1974_s13 = smov 8   ;;  %s299_s28 = int_to_ptr.vmem [resolvable:$true] %s298_s28 }
  0x14   : > { %p2073_p6 = pnand %p1533_p4, %p49_p1  ;;  %s307_s20 = sshll.u32 %s2314_s5, 4  ;;  %s308_s20 = int_to_ptr.hbm [resolvable:$true] %s307_s20 }
  0x15   : > { %s296_s22 = sshll.u32 %s2326_s4, 4  ;;  %s1975_s21 = smov [#allocation7]   ;;  %s297_s22 = int_to_ptr.hbm [resolvable:$true] %s296_s22 }
  0x16   : > { %s281_s26 = sshll.u32 %s2328_s3, 4  ;;  %s283_s1 = sshll.u32 %s1975_s21, 4  ;;  %s282_s26 = int_to_ptr.hbm [resolvable:$true] %s281_s26  ;;  %s284_s1 = int_to_ptr.vmem [resolvable:$true] %s283_s1 }
  0x17   : > { %1536 = dma.hbm_to_vmem [thread:$0]  (!%p2073_p6), %s265_s15, 4096, %s267_s19, [#allocation6], %s1973_s29, %s1973_s29, %s1974_s13  }
  0x18   : > { %1542 = dma.hbm_to_vmem [thread:$0]  (!%p2073_p6), %s297_s22, 16, %s299_s28, [#allocation9]  }
  0x19   : > { %1539 = dma.hbm_to_vmem [thread:$0]  (!%p2073_p6), %s282_s26, 2048, %s284_s1, [#allocation6], %s1973_s29, %s1973_s29, %s1974_s13  }
  0x1a   : > { %s1976_s15 = smov [#allocation10]   ;;  %s324_s25 = sshll.u32 %s2316_s7, 4  ;;  %s325_s25 = int_to_ptr.hbm [resolvable:$true] %s324_s25 }
  0x1b   : > { %s309_s19 = sshll.u32 %s1976_s15, 4  ;;  %s1977_s27 = smov [#allocation11]   ;;  %s310_s19 = int_to_ptr.vmem [resolvable:$true] %s309_s19 }
  0x1c   : > { %1545 = dma.hbm_to_vmem [thread:$0]  (!%p2073_p6), %s308_s20, 2048, %s310_s19, [#allocation9], %s1973_s29, %s1973_s29, %s1974_s13  }
  0x1d   : > { %s326_s1 = sshll.u32 %s1977_s27, 4  ;;  %s2319_s26 = smov 256   ;;  %s327_s1 = int_to_ptr.vmem [resolvable:$true] %s326_s1 }
  0x1e   : > { %s2320_s28 = smov 16   ;;  %s1423_s14 = sadd.s32 4294967294, %s1969_s12  }
  0x1f   : > { %1548 = dma.hbm_to_vmem [thread:$0]  (!%p2073_p6), %s325_s25, 4096, %s327_s1, [#allocation12], %s2319_s26, %s2319_s26, %s2320_s28  }
  0x20   : > { %s2101_s18 = sadd.s32 1, %s1969_s12   ;;  %s35_s21 = sadd.s32 1, %s1965_s11 }
  0x21   : > { %s32_s29 = ssub.s32 %s1969_s12, %s2101_s18  ;;  %p42_p7 = scmp.ne.s32.totalorder %s1965_s11, %s1961_s10 }
  0x22   : > { %p33_p8 = scmp.eq.s32.totalorder %s32_s29, 0  ;;  %p43_p9 = scmp.eq.s32.totalorder %s1969_s12, 0 }
  0x23   : > { %p48_p10 = scmp.ne.s32.totalorder %s1961_s10, %s1957_s30  ;;  %p240_p11 = scmp.eq.s32.totalorder %s2056_s16, 1 }
  0x24   : > { %s2113_s13 = scalar_select %p33_p8, %s1965_s11, %s35_s21  }
  0x25   : > { %p2117_p12 = por %p49_p1, %p48_p10  ;;  %p2121_p13 = por %p240_p11, %p42_p7 }
  0x26   : > { %p246_p0 = scmp.eq.s32.totalorder %s1423_s14, 1  ;;  %p44_p2 = por %p43_p9, %p42_p7 }
  0x27   : > { %s343_s15 = sand.u32 1, %s1965_s11   ;;  %p1562_p6 = scmp.lt.s32.totalorder %s1969_s12, 2 }
  0x28   : > { %p2126_p4 = por %p246_p0, %p48_p10  ;;  %s1431_s22 = sshll.u32 %s343_s15, 7 }
  0x29   : > { %s1474_s24 = sshll.u32 %s1969_s12, 7  ;;  %s347_s29 = scalar_lea.vmem [#allocation2], %s1431_s22 }
  0x2a   : > { %s353_s1 = scalar_lea.hbm %s2309_s0, %s1474_s24  ;;  %s356_s26 = sshll.u32 %s347_s29, 4  ;;  %s357_s26 = int_to_ptr.vmem [resolvable:$true] %s356_s26 }
  0x2b   : > { %s354_s21 = sshll.u32 %s353_s1, 4  ;;  %p2135_p8 = pnand %p1562_p6, %p44_p2  ;;  %s355_s21 = int_to_ptr.hbm [resolvable:$true] %s354_s21 }
  0x2c   : > { %s344_s28 = scalar_lea.sflag [#allocation3], %s343_s15  ;;  %s1861_s3 = sshra.s32 %s355_s21, 4  ;;  %s1862_s3 = int_to_ptr.hbm [resolvable:$true] %s1861_s3 }
  0x2d   : > { %s1863_s4 = scalar_lea.hbm %s1862_s3, 128  ;;  %p1865_p9 = pneg %p2135_p8 }
  0x2e   : > { %p1864_p7 = scmp.ne.s32.totalorder %s1862_s3, %s1863_s4  ;;  %s1868_s22 = scalar_lea.hbm %s2309_s0, 256 }
  0x2f   : > { %p1869_p0 = scmp.lt.s32.totalorder %s1862_s3, %s2309_s0  ;;  %p1870_p2 = scmp.lt.s32.totalorder %s1868_s22, %s1863_s4 }
  0x30   : > { %p1866_p10 = pnand %p1865_p9, %p1864_p7 }
  0x31   : > { %p1871_p6 = por %p1870_p2, %p1869_p0 }
  0x32   : > { %p1867_p11 = pneg %p1866_p10 }
  0x34   : > { %p1872_p5 = pnand %p1871_p6, %p1867_p11 }
  0x36   : > { %1875 = shalt.err (!%p1872_p5)
}
  0x37   : > { %s2333_s15 = smov 16   ;;  %s2334_s29 = smov 256  }
  0x38   : > { %1552 = dma.hbm_to_vmem [thread:$0]  (!%p2135_p8), %s355_s21, 2048, %s357_s26, %s344_s28, %s2334_s29, %s2334_s29, %s2333_s15  }
  0x39   : > { %368 = sbr.rel (%p2061_p3) target bundleno = 772 (0x304), region = 56  ;;  %s2155_s24 = sand.u32 (!%p2061_p3), 1, %s1961_s10  }
  0x3a   : > { %s1436_s3 = sshll.u32 (!%p2061_p3), %s2155_s24, 7  ;;  %s371_s4 = scalar_lea.sflag (!%p2061_p3), [#allocation3], %s2155_s24 }
  0x3b   : > { %s2161_s25 = scalar_lea.vmem (!%p2061_p3), [#allocation2], %s1436_s3 }
  0x3e   : > { %1936 = dma.done.wait (%p2117_p12), %s371_s4, 2048  }
  0x3f   : > { %1938 = vsyncadd (%p2117_p12), %s371_s4, 4294965248 }
  0x40   : > { %1940 = dma.done.wait (%p49_p1), [#allocation6], 6144  }
  0x41   : > { %1942 = vsyncadd (%p49_p1), [#allocation6], 4294961152 }
  0x42   : > { %1944 = dma.done.wait (%p49_p1), [#allocation9], 2064  }
  0x43   : > { %1946 = vsyncadd (%p49_p1), [#allocation9], 4294965232 }
  0x44   : > { %1948 = dma.done.wait (%p49_p1), [#allocation12], 4096  }
  0x45   : > { %1950 = vsyncadd (%p49_p1), [#allocation12], 4294963200  ;;  %v468_v0 = vld [vmem:[#allocation5 + $0x78] sm:$0xff]  ;;  %v467_v1 = vld [vmem:[#allocation5 + $0x70] sm:$0xff]  ;;  %s2257_s22 = scalar_lea.vmem [#allocation13], %s1436_s3  ;;  %s1476_s27 = sshll.u32 %s2056_s16, 7 }
  0x46   : > { %v484_v2 = vld [vmem:[#allocation5 + $0xf8] sm:$0xff]  ;;  %489 = vmatpush.msra.mxu0 %v468_v0  ;;  %v483_v3 = vld [vmem:[#allocation5 + $0xf0] sm:$0xff]  ;;  %v466_v4 = vld [vmem:[#allocation5 + $0x68] sm:$0xff]  ;;  %1477 = vmatpush.msra.mxu2 %v468_v0  ;;  %s1298_s29 = scalar_lea.hbm %s2318_s9, %s1476_s27  ;;  %s1299_s3 = sshll.u32 %s2257_s22, 4  ;;  %s1300_s3 = int_to_ptr.vmem [resolvable:$true] %s1299_s3 }
  0x47   : > { %530 = vmatpush.msra.mxu1 %v484_v2  ;;  %v482_v5 = vld [vmem:[#allocation5 + $0xe8] sm:$0xff]  ;;  %1493 = vmatpush.msra.mxu3 %v484_v2  ;;  %v465_v6 = vld [vmem:[#allocation5 + $0x60] sm:$0xff]  ;;  %v464_v8 = vld [vmem:[#allocation5 + $0x58] sm:$0xff]  ;;  %s1301_s4 = sshll.u32 %s1298_s29, 4  ;;  %s1286_s16 = scalar_lea.sflag [#allocation4], %s2155_s24  ;;  %s1302_s4 = int_to_ptr.hbm [resolvable:$true] %s1301_s4 }
  0x48   : > { %490 = vmatpush.msra.mxu0 %v467_v1  ;;  %v481_v7 = vld [vmem:[#allocation5 + $0xe0] sm:$0xff]  ;;  %1478 = vmatpush.msra.mxu2 %v467_v1  ;;  %v480_v9 = vld [vmem:[#allocation5 + $0xd8] sm:$0xff]  ;;  %v463_v10 = vld [vmem:[#allocation5 + $0x50] sm:$0xff]  ;;  %s1911_s23 = scalar_lea.hbm %s2318_s9, 256 }
  0x49   : > { %531 = vmatpush.msra.mxu1 %v483_v3  ;;  %1494 = vmatpush.msra.mxu3 %v483_v3  ;;  %v479_v11 = vld [vmem:[#allocation5 + $0xd0] sm:$0xff]  ;;  %v462_v12 = vld [vmem:[#allocation5 + $0x48] sm:$0xff]  ;;  %v461_v14 = vld [vmem:[#allocation5 + $0x40] sm:$0xff] }
  0x4a   : > { %491 = vmatpush.msra.mxu0 %v466_v4  ;;  %1479 = vmatpush.msra.mxu2 %v466_v4  ;;  %v478_v13 = vld [vmem:[#allocation5 + $0xc8] sm:$0xff]  ;;  %v477_v15 = vld [vmem:[#allocation5 + $0xc0] sm:$0xff]  ;;  %v460_v16 = vld [vmem:[#allocation5 + $0x38] sm:$0xff] }
  0x4b   : > { %532 = vmatpush.msra.mxu1 %v482_v5  ;;  %1495 = vmatpush.msra.mxu3 %v482_v5  ;;  %v476_v17 = vld [vmem:[#allocation5 + $0xb8] sm:$0xff]  ;;  %v459_v18 = vld [vmem:[#allocation5 + $0x30] sm:$0xff]  ;;  %v458_v20 = vld [vmem:[#allocation5 + $0x28] sm:$0xff] }
  0x4c   : > { %492 = vmatpush.msra.mxu0 %v465_v6  ;;  %1480 = vmatpush.msra.mxu2 %v465_v6  ;;  %v475_v19 = vld [vmem:[#allocation5 + $0xb0] sm:$0xff]  ;;  %v474_v21 = vld [vmem:[#allocation5 + $0xa8] sm:$0xff]  ;;  %v457_v22 = vld [vmem:[#allocation5 + $0x20] sm:$0xff] }
  0x4d   : > { %533 = vmatpush.msra.mxu1 %v481_v7  ;;  %1496 = vmatpush.msra.mxu3 %v481_v7  ;;  %v473_v23 = vld [vmem:[#allocation5 + $0xa0] sm:$0xff]  ;;  %v456_v24 = vld [vmem:[#allocation5 + $0x18] sm:$0xff]  ;;  %v455_v26 = vld [vmem:[#allocation5 + $0x10] sm:$0xff] }
  0x4e   : > { %493 = vmatpush.msra.mxu0 %v464_v8  ;;  %1481 = vmatpush.msra.mxu2 %v464_v8  ;;  %v472_v25 = vld [vmem:[#allocation5 + $0x98] sm:$0xff]  ;;  %v471_v27 = vld [vmem:[#allocation5 + $0x90] sm:$0xff]  ;;  %v454_v28 = vld [vmem:[#allocation5 + $0x8] sm:$0xff] }
  0x4f   : > { %534 = vmatpush.msra.mxu1 %v480_v9  ;;  %1497 = vmatpush.msra.mxu3 %v480_v9  ;;  %v470_v29 = vld [vmem:[#allocation5 + $0x88] sm:$0xff]  ;;  %v453_v30 = vld [vmem:[#allocation5] sm:$0xff]  ;;  %v439_v36 = vld [vmem:[%s2161_s25 + $0x10] sm:$0xff] }
  0x50   : > { %494 = vmatpush.msra.mxu0 %v463_v10  ;;  %1482 = vmatpush.msra.mxu2 %v463_v10  ;;  %v469_v31 = vld [vmem:[#allocation5 + $0x80] sm:$0xff]  ;;  %v438_v33 = vld [vmem:[%s2161_s25 + $0x8] sm:$0xff]  ;;  %v440_v37 = vld [vmem:[%s2161_s25 + $0x18] sm:$0xff] }
  0x51   : > { %535 = vmatpush.msra.mxu1 %v479_v11  ;;  %1498 = vmatpush.msra.mxu3 %v479_v11  ;;  %v437_v32 = vld [vmem:[%s2161_s25] sm:$0xff]  ;;  %v446_v35 = vld [vmem:[%s2161_s25 + $0x48] sm:$0xff]  ;;  %v447_v38 = vld [vmem:[%s2161_s25 + $0x50] sm:$0xff] }
  0x52   : > { %495 = vmatpush.msra.mxu0 %v462_v12  ;;  %1483 = vmatpush.msra.mxu2 %v462_v12  ;;  %v445_v34 = vld [vmem:[%s2161_s25 + $0x40] sm:$0xff]  ;;  %v448_v39 = vld [vmem:[%s2161_s25 + $0x58] sm:$0xff]  ;;  %v442_v41 = vld [vmem:[%s2161_s25 + $0x28] sm:$0xff] }
  0x53   : > { %536 = vmatpush.msra.mxu1 %v478_v13  ;;  %1499 = vmatpush.msra.mxu3 %v478_v13  ;;  %v441_v40 = vld [vmem:[%s2161_s25 + $0x20] sm:$0xff]  ;;  %v450_v43 = vld [vmem:[%s2161_s25 + $0x68] sm:$0xff]  ;;  %v443_v44 = vld [vmem:[%s2161_s25 + $0x30] sm:$0xff] }
  0x54   : > { %496 = vmatpush.msra.mxu0 %v461_v14  ;;  %1484 = vmatpush.msra.mxu2 %v461_v14  ;;  %v449_v42 = vld [vmem:[%s2161_s25 + $0x60] sm:$0xff]  ;;  %v444_v45 = vld [vmem:[%s2161_s25 + $0x38] sm:$0xff]  ;;  %v451_v46 = vld [vmem:[%s2161_s25 + $0x70] sm:$0xff] }
  0x55   : > { %537 = vmatpush.msra.mxu1 %v477_v15  ;;  %1500 = vmatpush.msra.mxu3 %v477_v15  ;;  %v452_v47 = vld [vmem:[%s2161_s25 + $0x78] sm:$0xff]  ;;  %v737_v49 = vld [vmem:[#allocation7 + $0x70] sm:$0xff]  ;;  %v736_v50 = vld [vmem:[#allocation7 + $0x68] sm:$0xff]  ;;  %s1905_s25 = sshra.s32 %s1302_s4, 4  ;;  %s1906_s25 = int_to_ptr.hbm [resolvable:$true] %s1905_s25 }
  0x56   : > { %497 = vmatpush.msra.mxu0 %v460_v16  ;;  %1485 = vmatpush.msra.mxu2 %v460_v16  ;;  %v738_v48 = vld [vmem:[#allocation7 + $0x78] sm:$0xff]  ;;  %v735_v51 = vld [vmem:[#allocation7 + $0x60] sm:$0xff]  ;;  %v733_v53 = vld [vmem:[#allocation7 + $0x50] sm:$0xff]  ;;  %s1907_s17 = scalar_lea.hbm %s1906_s25, 128  ;;  %p1912_p12 = scmp.lt.s32.totalorder %s1906_s25, %s2318_s9 }
  0x57   : > { %538 = vmatpush.msra.mxu1 %v476_v17  ;;  %1501 = vmatpush.msra.mxu3 %v476_v17  ;;  %v734_v52 = vld [vmem:[#allocation7 + $0x58] sm:$0xff]  ;;  %v732_v54 = vld [vmem:[#allocation7 + $0x48] sm:$0xff]  ;;  %v731_v55 = vld [vmem:[#allocation7 + $0x40] sm:$0xff]  ;;  %p1908_p1 = scmp.ne.s32.totalorder %s1906_s25, %s1907_s17  ;;  %p1913_p8 = scmp.lt.s32.totalorder %s1911_s23, %s1907_s17 }
  0x58   : > { %498 = vmatpush.msra.mxu0 %v459_v18  ;;  %1486 = vmatpush.msra.mxu2 %v459_v18  ;;  %v730_v56 = vld [vmem:[#allocation7 + $0x38] sm:$0xff]  ;;  %v729_v57 = vld [vmem:[#allocation7 + $0x30] sm:$0xff]  ;;  %v728_v58 = vld [vmem:[#allocation7 + $0x28] sm:$0xff] }
  0x59   : > { %539 = vmatpush.msra.mxu1 %v475_v19  ;;  %1502 = vmatpush.msra.mxu3 %v475_v19  ;;  %v727_v59 = vld [vmem:[#allocation7 + $0x20] sm:$0xff]  ;;  %v726_v60 = vld [vmem:[#allocation7 + $0x18] sm:$0xff]  ;;  %v725_v61 = vld [vmem:[#allocation7 + $0x10] sm:$0xff]  ;;  %p1909_p3 = pnand %p1908_p1, %p2121_p13  ;;  %p1914_p7 = por %p1913_p8, %p1912_p12 }
  0x5a   : > { %499 = vmatpush.msra.mxu0 %v458_v20  ;;  %1487 = vmatpush.msra.mxu2 %v458_v20  ;;  %v2198_v62 = vld [vmem:[%s2311_s2] ss:$0 sm:$0xff]  ;;  %v724_v63 = vld [vmem:[#allocation7 + $0x8] sm:$0xff] }
  0x5b   : > { %540 = vmatpush.msra.mxu1 %v474_v21  ;;  %1503 = vmatpush.msra.mxu3 %v474_v21  ;;  %v723_v0 = vld [vmem:[#allocation7] sm:$0xff]  ;;  %p1910_p5 = pneg %p1909_p3 }
  0x5c   : > { %500 = vmatpush.msra.mxu0 %v457_v22  ;;  %1488 = vmatpush.msra.mxu2 %v457_v22 }
  0x5d   : > { %541 = vmatpush.msra.mxu1 %v473_v23  ;;  %1504 = vmatpush.msra.mxu3 %v473_v23  ;;  %p1915_p9 = pnand %p1914_p7, %p1910_p5 }
  0x5e   : > { %501 = vmatpush.msra.mxu0 %v456_v24  ;;  %1489 = vmatpush.msra.mxu2 %v456_v24 }
  0x5f   : > { %542 = vmatpush.msra.mxu1 %v472_v25  ;;  %1505 = vmatpush.msra.mxu3 %v472_v25 }
  0x60   : > { %502 = vmatpush.msra.mxu0 %v455_v26  ;;  %1490 = vmatpush.msra.mxu2 %v455_v26 }
  0x61   : > { %543 = vmatpush.msra.mxu1 %v471_v27  ;;  %1506 = vmatpush.msra.mxu3 %v471_v27 }
  0x62   : > { %503 = vmatpush.msra.mxu0 %v454_v28  ;;  %1491 = vmatpush.msra.mxu2 %v454_v28 }
  0x63   : > { %544 = vmatpush.msra.mxu1 %v470_v29  ;;  %1507 = vmatpush.msra.mxu3 %v470_v29 }
  0x64   : > { %504 = vmatpush.msra.mxu0 %v453_v30  ;;  %1492 = vmatpush.msra.mxu2 %v453_v30 }
  0x65   : > { %545 = vmatpush.msra.mxu1 %v469_v31  ;;  %505 = vmatmul.f32.vlgmr.msra.gmra.mxu0 %v437_v32 }
  0x66   : > { %546 = vmatmul.f32.vlgmr.msra.gmra.mxu1 %v438_v33  ;;  %1508 = vmatpush.msra.mxu3 %v469_v31 }
  0x67   : > { %517 = vmatmul.f32.vlgmr.msra.gmra.mxu2 %v445_v34  ;;  %558 = vmatmul.f32.vlgmr.msra.gmra.mxu3 %v446_v35 }
  0x68   : > { %743 = vmatpush.msrb.mxu2 %v738_v48 }
  0x6a   : > { %744 = vmatpush.msrb.mxu2 %v737_v49 }
  0x6c   : > { %745 = vmatpush.msrb.mxu2 %v736_v50 }
  0x6d   : > { %508 = vmatmul.f32.gmra.mxu0 %v439_v36 }
  0x6e   : > { %549 = vmatmul.f32.gmra.mxu1 %v440_v37  ;;  %746 = vmatpush.msrb.mxu2 %v735_v51 }
  0x6f   : > { %520 = vmatmul.f32.gmra.mxu2 %v447_v38  ;;  %561 = vmatmul.f32.gmra.mxu3 %v448_v39 }
  0x70   : > { %747 = vmatpush.msrb.mxu2 %v734_v52 }
  0x72   : > { %748 = vmatpush.msrb.mxu2 %v733_v53 }
  0x74   : > { %749 = vmatpush.msrb.mxu2 %v732_v54 }
  0x75   : > { %511 = vmatmul.f32.gmra.mxu0 %v441_v40 }
  0x76   : > { %552 = vmatmul.f32.gmra.mxu1 %v442_v41  ;;  %750 = vmatpush.msrb.mxu2 %v731_v55 }
  0x77   : > { %523 = vmatmul.f32.gmra.mxu2 %v449_v42  ;;  %564 = vmatmul.f32.gmra.mxu3 %v450_v43 }
  0x78   : > { %751 = vmatpush.msrb.mxu2 %v730_v56 }
  0x7a   : > { %752 = vmatpush.msrb.mxu2 %v729_v57 }
  0x7c   : > { %753 = vmatpush.msrb.mxu2 %v728_v58 }
  0x7d   : > { %514 = vmatmul.f32.gmra.mxu0 %v443_v44 }
  0x7e   : > { %555 = vmatmul.f32.gmra.mxu1 %v444_v45  ;;  %754 = vmatpush.msrb.mxu2 %v727_v59 }
  0x7f   : > { %526 = vmatmul.f32.gmra.mxu2 %v451_v46  ;;  %567 = vmatmul.f32.gmra.mxu3 %v452_v47 }
  0x80   : > { %755 = vmatpush.msrb.mxu2 %v726_v60 }
  0x82   : > { %756 = vmatpush.msrb.mxu2 %v725_v61 }
  0x84   : > { %757 = vmatpush.msrb.mxu2 %v724_v63 }
  0x86   : > { %758 = vmatpush.msrb.mxu2 %v723_v0 }
  0xe2   : > { %v506_v1 = vpop.f32.mrf.mxu0 }
  0xe3   : > { %v547_v2 = vpop.f32.mrf.mxu1  ;;  %v507_v3 = vadd.f32 %v2198_v62, %v506_v1 }
  0xe5   : > { %v548_v4 = vadd.f32 %v547_v2, %v507_v3 }
  0xe7   : > { %v1443_v5 = vmul.f32 -1.442695, %v548_v4 }
  0xe9   : > { %1615 = vpow2.f32 %v1443_v5 }
  0xea   : > { %v509_v6 = vpop.f32.mrf.mxu0  ;;  %v518_v9 = vpop.f32.mrf.mxu2 }
  0xeb   : > { %v550_v7 = vpop.f32.mrf.mxu1  ;;  %v510_v8 = vadd.f32 %v2198_v62, %v509_v6  ;;  %v559_v10 = vpop.f32.mrf.mxu3  ;;  %v519_v11 = vadd.f32 %v2198_v62, %v518_v9 }
  0xed   : > { %v551_v12 = vadd.f32 %v550_v7, %v510_v8  ;;  %v560_v16 = vadd.f32 %v559_v10, %v519_v11 }
  0xef   : > { %v1616_v13 = vpop.eup %1615  ;;  %v1444_v14 = vmul.f32 -1.442695, %v551_v12  ;;  %v1447_v22 = vmul.f32 -1.442695, %v560_v16 }
  0xf0   : > { %v595_v15 = vadd.f32 1.0, %v1616_v13 }
  0xf1   : > { %1617 = vpow2.f32 %v1444_v14 }
  0xf2   : > { %1619 = vrcp.f32 %v595_v15  ;;  %v512_v17 = vpop.f32.mrf.mxu0  ;;  %v521_v20 = vpop.f32.mrf.mxu2  ;;  %v612_v37 = vand.u32 2147483647, %v595_v15  ;;  %v614_v38 = vand.u32 2147483648, %v595_v15  ;;  %vm608_vm1 = vweird.f32 %v595_v15 }
  0xf3   : > { %v553_v18 = vpop.f32.mrf.mxu1  ;;  %v513_v19 = vadd.f32 %v2198_v62, %v512_v17  ;;  %v562_v21 = vpop.f32.mrf.mxu3  ;;  %v522_v23 = vadd.f32 %v2198_v62, %v521_v20  ;;  %1621 = vpow2.f32 %v1447_v22 }
  0xf4   : > { %vm613_vm3 = vcmp.eq.f32.partialorder %v612_v37, 8.507059e+37  ;;  %v615_v49 = vor.u32 1.1754944e-38, %v614_v38 }
  0xf5   : > { %v554_v24 = vadd.f32 %v553_v18, %v513_v19  ;;  %v563_v29 = vadd.f32 %v562_v21, %v522_v23 }
  0xf7   : > { %v1618_v25 = vpop.eup %1617  ;;  %v1445_v26 = vmul.f32 -1.442695, %v554_v24  ;;  %v1448_v36 = vmul.f32 -1.442695, %v563_v29 }
  0xf8   : > { %v1620_v27 = vpop.eup %1619  ;;  %v596_v28 = vadd.f32 1.0, %v1618_v25 }
  0xf9   : > { %1623 = vpow2.f32 %v1445_v26  ;;  %v604_v30 = vmul.f32 %v1620_v27, %v595_v15  ;;  %vm609_vm0 = vweird.f32 %v1620_v27  ;;  %v1622_v43 = vpop.eup %1621 }
  0xfa   : > { %1625 = vrcp.f32 %v596_v28  ;;  %v515_v31 = vpop.f32.mrf.mxu0  ;;  %v524_v35 = vpop.f32.mrf.mxu2  ;;  %vm610_vm2 = vmor %vm608_vm1, %vm609_vm0  ;;  %v2207_v53 = vadd.f32 1.0, %v1622_v43  ;;  %v627_v57 = vand.u32 2147483647, %v596_v28  ;;  %v629_v58 = vand.u32 2147483648, %v596_v28  ;;  %v951_v43 = vld [vmem:[#allocation10 + $0x78] sm:$0xff] }
  0xfb   : > { %v556_v32 = vpop.f32.mrf.mxu1  ;;  %v516_v33 = vadd.f32 %v2198_v62, %v515_v31  ;;  %v605_v34 = vsub.f32 1.0, %v604_v30  ;;  %v565_v39 = vpop.f32.mrf.mxu3  ;;  %v525_v42 = vadd.f32 %v2198_v62, %v524_v35  ;;  %1627 = vpow2.f32 %v1448_v36  ;;  %956 = vmatpush.msrb.mxu3 %v951_v43 }
  0xfc   : > { %vm623_vm5 = vweird.f32 %v596_v28  ;;  %vm628_vm7 = vcmp.eq.f32.partialorder %v627_v57, 8.507059e+37  ;;  %v630_v5 = vor.u32 1.1754944e-38, %v629_v58  ;;  %vm668_vm0 = vweird.f32 %v2207_v53 }
  0xfd   : > { %v557_v40 = vadd.f32 %v556_v32, %v516_v33  ;;  %v606_v41 = vmul.f32 %v1620_v27, %v605_v34  ;;  %v566_v51 = vadd.f32 %v565_v39, %v525_v42  ;;  %v674_v39 = vand.u32 2147483648, %v2207_v53 }
  0xff   : > { %v1624_v44 = vpop.eup %1623  ;;  %v1446_v45 = vmul.f32 -1.442695, %v557_v40  ;;  %v607_v46 = vadd.f32 %v1620_v27, %v606_v41  ;;  %v1449_v59 = vmul.f32 -1.442695, %v566_v51  ;;  %v672_v41 = vand.u32 2147483647, %v2207_v53 }
 0x100   : > { %v1626_v47 = vpop.eup %1625  ;;  %v597_v48 = vadd.f32 1.0, %v1624_v44 }
 0x101   : > { %1629 = vpow2.f32 %v1446_v45  ;;  %v611_v50 = vsel %vm610_vm2, %v1620_v27, %v607_v46  ;;  %v619_v52 = vmul.f32 %v1626_v47, %v596_v28  ;;  %vm624_vm4 = vweird.f32 %v1626_v47  ;;  %v1628_v63 = vpop.eup %1627 }
 0x102   : > { %1631 = vrcp.f32 %v597_v48  ;;  %v616_v54 = vsel %vm613_vm3, %v615_v49, %v611_v50  ;;  %v527_v56 = vpop.f32.mrf.mxu2  ;;  %vm625_vm6 = vmor %vm623_vm5, %vm624_vm4  ;;  %v2211_v9 = vadd.f32 1.0, %v1628_v63  ;;  %v644_v12 = vand.u32 2147483648, %v597_v48 }
 0x103   : > { %759 = vmatmul.f32.vlgmr.msrb.gmra.mxu2 %v616_v54  ;;  %v620_v55 = vsub.f32 1.0, %v619_v52  ;;  %v528_v61 = vadd.f32 %v2198_v62, %v527_v56  ;;  %1633 = vrcp.f32 %v2207_v53  ;;  %v568_v0 = vpop.f32.mrf.mxu3  ;;  %v642_v15 = vand.u32 2147483647, %v597_v48 }
 0x104   : > { %1635 = vpow2.f32 %v1449_v59  ;;  %vm638_vm9 = vweird.f32 %v597_v48  ;;  %v645_v20 = vor.u32 1.1754944e-38, %v644_v12  ;;  %v675_v45 = vor.u32 1.1754944e-38, %v674_v39  ;;  %v948_v12 = vld [vmem:[#allocation10 + $0x60] sm:$0xff] }
 0x105   : > { %v621_v60 = vmul.f32 %v1626_v47, %v620_v55  ;;  %v569_v7 = vadd.f32 %v568_v0, %v528_v61  ;;  %vm643_vm11 = vcmp.eq.f32.partialorder %v642_v15, 8.507059e+37  ;;  %vm673_vm3 = vcmp.eq.f32.partialorder %v672_v41, 8.507059e+37  ;;  %v945_v15 = vld [vmem:[#allocation10 + $0x48] sm:$0xff] }
 0x106   : > { %vm683_vm4 = vweird.f32 %v2211_v9  ;;  %v689_v50 = vand.u32 2147483648, %v2211_v9  ;;  %v687_v52 = vand.u32 2147483647, %v2211_v9 }
 0x107   : > { %v1630_v1 = vpop.eup %1629  ;;  %v622_v2 = vadd.f32 %v1626_v47, %v621_v60  ;;  %v1450_v13 = vmul.f32 -1.442695, %v569_v7 }
 0x108   : > { %v1632_v3 = vpop.eup %1631  ;;  %v598_v4 = vadd.f32 1.0, %v1630_v1  ;;  %v690_v55 = vor.u32 1.1754944e-38, %v689_v50 }
 0x109   : > { %v626_v6 = vsel %vm625_vm6, %v1626_v47, %v622_v2  ;;  %v634_v8 = vmul.f32 %v1632_v3, %v597_v48  ;;  %v1634_v11 = vpop.eup %1633  ;;  %vm639_vm8 = vweird.f32 %v1632_v3 }
 0x10a   : > { %1637 = vrcp.f32 %v598_v4  ;;  %v631_v62 = vsel %vm628_vm7, %v630_v5, %v626_v6  ;;  %v1636_v16 = vpop.eup %1635  ;;  %v664_v18 = vmul.f32 %v1634_v11, %v2207_v53  ;;  %vm640_vm10 = vmor %vm638_vm9, %vm639_vm8  ;;  %v659_v28 = vand.u32 2147483648, %v598_v4 }
 0x10b   : > { %762 = vmatmul.f32.gmra.mxu2 %v631_v62  ;;  %v635_v10 = vsub.f32 1.0, %v634_v8  ;;  %1639 = vrcp.f32 %v2211_v9  ;;  %v2215_v23 = vadd.f32 1.0, %v1636_v16  ;;  %v657_v30 = vand.u32 2147483647, %v598_v4  ;;  %v944_v16 = vld [vmem:[#allocation10 + $0x40] sm:$0xff] }
 0x10c   : > { %1641 = vpow2.f32 %v1450_v13  ;;  %v665_v26 = vsub.f32 1.0, %v664_v18  ;;  %vm653_vm13 = vweird.f32 %v598_v4  ;;  %v660_v35 = vor.u32 1.1754944e-38, %v659_v28  ;;  %v947_v13 = vld [vmem:[#allocation10 + $0x58] sm:$0xff]  ;;  %v942_v18 = vld [vmem:[#allocation10 + $0x30] sm:$0xff] }
 0x10d   : > { %v636_v14 = vmul.f32 %v1632_v3, %v635_v10  ;;  %1643 = vrcp.f32 %v2215_v23  ;;  %vm658_vm15 = vcmp.eq.f32.partialorder %v657_v30, 8.507059e+37  ;;  %vm669_vm1 = vweird.f32 %v1634_v11  ;;  %v950_v10 = vld [vmem:[#allocation10 + $0x70] sm:$0xff] }
 0x10e   : > { %v666_v33 = vmul.f32 %v1634_v11, %v665_v26  ;;  %vm670_vm2 = vmor %vm668_vm0, %vm669_vm1  ;;  %vm688_vm7 = vcmp.eq.f32.partialorder %v687_v52, 8.507059e+37  ;;  %vm698_vm8 = vweird.f32 %v2215_v23  ;;  %v704_v60 = vand.u32 2147483648, %v2215_v23  ;;  %957 = vmatpush.msrb.mxu3 %v950_v10 }
 0x10f   : > { %v637_v17 = vadd.f32 %v1632_v3, %v636_v14  ;;  %v702_v63 = vand.u32 2147483647, %v2215_v23  ;;  %v946_v14 = vld [vmem:[#allocation10 + $0x50] sm:$0xff] }
 0x110   : > { %v1638_v19 = vpop.eup %1637  ;;  %v667_v40 = vadd.f32 %v1634_v11, %v666_v33  ;;  %v705_v1 = vor.u32 1.1754944e-38, %v704_v60 }
 0x111   : > { %v641_v21 = vsel %vm640_vm10, %v1632_v3, %v637_v17  ;;  %v649_v22 = vmul.f32 %v1638_v19, %v598_v4  ;;  %v1640_v27 = vpop.eup %1639  ;;  %vm654_vm12 = vweird.f32 %v1638_v19  ;;  %v943_v17 = vld [vmem:[#allocation10 + $0x38] sm:$0xff] }
 0x112   : > { %v646_v24 = vsel %vm643_vm11, %v645_v20, %v641_v21  ;;  %v1642_v31 = vpop.eup %1641  ;;  %v679_v34 = vmul.f32 %v1640_v27, %v2211_v9  ;;  %vm655_vm14 = vmor %vm653_vm13, %vm654_vm12  ;;  %v671_v46 = vsel %vm670_vm2, %v1634_v11, %v667_v40  ;;  %vm684_vm5 = vweird.f32 %v1640_v27  ;;  %v949_v11 = vld [vmem:[#allocation10 + $0x68] sm:$0xff]  ;;  %v940_v20 = vld [vmem:[#allocation10 + $0x20] sm:$0xff] }
 0x113   : > { %765 = vmatmul.f32.gmra.mxu2 %v646_v24  ;;  %v650_v25 = vsub.f32 1.0, %v649_v22  ;;  %v602_v37 = vadd.f32 1.0, %v1642_v31  ;;  %v1644_v44 = vpop.eup %1643  ;;  %v676_v49 = vsel %vm673_vm3, %v675_v45, %v671_v46  ;;  %vm685_vm6 = vmor %vm683_vm4, %vm684_vm5  ;;  %vm703_vm11 = vcmp.eq.f32.partialorder %v702_v63, 8.507059e+37  ;;  %958 = vmatpush.msrb.mxu3 %v949_v11  ;;  %v939_v21 = vld [vmem:[#allocation10 + $0x18] sm:$0xff]  ;;  %v938_v22 = vld [vmem:[#allocation10 + $0x10] sm:$0xff] }
 0x114   : > { %v680_v42 = vsub.f32 1.0, %v679_v34  ;;  %v694_v48 = vmul.f32 %v1644_v44, %v2215_v23  ;;  %vm699_vm9 = vweird.f32 %v1644_v44  ;;  %v937_v23 = vld [vmem:[#allocation10 + $0x8] sm:$0xff]  ;;  %v2229_v24 = vld [vmem:[#allocation8] ss:$0 sm:$0xff] }
 0x115   : > { %v651_v29 = vmul.f32 %v1638_v19, %v650_v25  ;;  %1645 = vrcp.f32 %v602_v37  ;;  %vm700_vm10 = vmor %vm698_vm8, %vm699_vm9  ;;  %vm713_vm12 = vweird.f32 %v602_v37  ;;  %v719_v5 = vand.u32 2147483648, %v602_v37  ;;  %959 = vmatpush.msrb.mxu3 %v948_v12  ;;  %v936_v25 = vld [vmem:[#allocation10] sm:$0xff] }
 0x116   : > { %v681_v47 = vmul.f32 %v1640_v27, %v680_v42  ;;  %v695_v53 = vsub.f32 1.0, %v694_v48  ;;  %v717_v7 = vand.u32 2147483647, %v602_v37 }
 0x117   : > { %v652_v32 = vadd.f32 %v1638_v19, %v651_v29  ;;  %v720_v8 = vor.u32 1.1754944e-38, %v719_v5  ;;  %960 = vmatpush.msrb.mxu3 %v947_v13 }
 0x118   : > { %v682_v51 = vadd.f32 %v1640_v27, %v681_v47  ;;  %v696_v57 = vmul.f32 %v1644_v44, %v695_v53 }
 0x119   : > { %v656_v36 = vsel %vm655_vm14, %v1638_v19, %v652_v32  ;;  %961 = vmatpush.msrb.mxu3 %v946_v14  ;;  %v941_v19 = vld [vmem:[#allocation10 + $0x28] sm:$0xff] }
 0x11a   : > { %v661_v38 = vsel %vm658_vm15, %v660_v35, %v656_v36  ;;  %v686_v56 = vsel %vm685_vm6, %v1640_v27, %v682_v51  ;;  %v697_v61 = vadd.f32 %v1644_v44, %v696_v57  ;;  %vm718_vm15 = vcmp.eq.f32.partialorder %v717_v7, 8.507059e+37 }
 0x11b   : > { %768 = vmatmul.f32.gmra.mxu2 %v661_v38  ;;  %v1646_v54 = vpop.eup %1645  ;;  %v691_v59 = vsel %vm688_vm7, %v690_v55, %v686_v56  ;;  %962 = vmatpush.msrb.mxu3 %v945_v15 }
 0x11c   : > { %v709_v58 = vmul.f32 %v1646_v54, %v602_v37  ;;  %v701_v2 = vsel %vm700_vm10, %v1644_v44, %v697_v61  ;;  %vm714_vm13 = vweird.f32 %v1646_v54 }
 0x11d   : > { %v706_v4 = vsel %vm703_vm11, %v705_v1, %v701_v2  ;;  %vm715_vm14 = vmor %vm713_vm12, %vm714_vm13  ;;  %963 = vmatpush.msrb.mxu3 %v944_v16 }
 0x11e   : > { %v710_v0 = vsub.f32 1.0, %v709_v58 }
 0x11f   : > { %964 = vmatpush.msrb.mxu3 %v943_v17 }
 0x120   : > { %v711_v3 = vmul.f32 %v1646_v54, %v710_v0 }
 0x121   : > { %965 = vmatpush.msrb.mxu3 %v942_v18 }
 0x122   : > { %v712_v6 = vadd.f32 %v1646_v54, %v711_v3 }
 0x123   : > { %771 = vmatmul.f32.gmra.mxu2 %v676_v49  ;;  %966 = vmatpush.msrb.mxu3 %v941_v19 }
 0x124   : > { %v716_v9 = vsel %vm715_vm14, %v1646_v54, %v712_v6 }
 0x125   : > { %v721_v62 = vsel %vm718_vm15, %v720_v8, %v716_v9  ;;  %967 = vmatpush.msrb.mxu3 %v940_v20 }
 0x127   : > { %968 = vmatpush.msrb.mxu3 %v939_v21 }
 0x129   : > { %969 = vmatpush.msrb.mxu3 %v938_v22 }
 0x12b   : > { %774 = vmatmul.f32.gmra.mxu2 %v691_v59  ;;  %970 = vmatpush.msrb.mxu3 %v937_v23 }
 0x12d   : > { %971 = vmatpush.msrb.mxu3 %v936_v25 }
 0x133   : > { %777 = vmatmul.f32.gmra.mxu2 %v706_v4 }
 0x13b   : > { %780 = vmatmul.f32.gmra.mxu2 %v721_v62 }
 0x186   : > { %v760_v26 = vpop.f32.mrf.mxu2 }
 0x187   : > { %v761_v27 = vadd.f32 %v2229_v24, %v760_v26 }
 0x189   : > { %v1451_v28 = vmul.f32 -1.442695, %v761_v27 }
 0x18b   : > { %1647 = vpow2.f32 %v1451_v28 }
 0x18e   : > { %v763_v29 = vpop.f32.mrf.mxu2 }
 0x18f   : > { %v764_v30 = vadd.f32 %v2229_v24, %v763_v29 }
 0x191   : > { %v1648_v31 = vpop.eup %1647  ;;  %v1452_v32 = vmul.f32 -1.442695, %v764_v30 }
 0x192   : > { %v808_v33 = vadd.f32 1.0, %v1648_v31 }
 0x193   : > { %1649 = vpow2.f32 %v1452_v32 }
 0x194   : > { %1651 = vrcp.f32 %v808_v33  ;;  %v827_v43 = vand.u32 2147483648, %v808_v33  ;;  %v825_v46 = vand.u32 2147483647, %v808_v33  ;;  %vm821_vm1 = vweird.f32 %v808_v33 }
 0x196   : > { %v766_v34 = vpop.f32.mrf.mxu2  ;;  %v828_v52 = vor.u32 1.1754944e-38, %v827_v43  ;;  %vm826_vm3 = vcmp.eq.f32.partialorder %v825_v46, 8.507059e+37 }
 0x197   : > { %v767_v35 = vadd.f32 %v2229_v24, %v766_v34 }
 0x199   : > { %v1650_v36 = vpop.eup %1649  ;;  %v1453_v37 = vmul.f32 -1.442695, %v767_v35 }
 0x19a   : > { %v1652_v38 = vpop.eup %1651  ;;  %v809_v39 = vadd.f32 1.0, %v1650_v36 }
 0x19b   : > { %1653 = vpow2.f32 %v1453_v37  ;;  %v817_v40 = vmul.f32 %v1652_v38, %v808_v33  ;;  %vm822_vm0 = vweird.f32 %v1652_v38 }
 0x19c   : > { %1655 = vrcp.f32 %v809_v39  ;;  %vm823_vm2 = vmor %vm821_vm1, %vm822_vm0  ;;  %v842_v58 = vand.u32 2147483648, %v809_v39  ;;  %v840_v61 = vand.u32 2147483647, %v809_v39  ;;  %vm836_vm5 = vweird.f32 %v809_v39 }
 0x19d   : > { %v818_v41 = vsub.f32 1.0, %v817_v40  ;;  %v1180_v40 = vld [vmem:[#allocation11 + $0xf8] sm:$0xff] }
 0x19e   : > { %v769_v42 = vpop.f32.mrf.mxu2  ;;  %v843_v4 = vor.u32 1.1754944e-38, %v842_v58  ;;  %vm841_vm7 = vcmp.eq.f32.partialorder %v840_v61, 8.507059e+37  ;;  %1228 = vmatpush.msrb.mxu1 %v1180_v40  ;;  %v1160_v40 = vld [vmem:[#allocation11 + $0x58] sm:$0xff] }
 0x19f   : > { %v770_v44 = vadd.f32 %v2229_v24, %v769_v42  ;;  %v819_v45 = vmul.f32 %v1652_v38, %v818_v41 }
 0x1a1   : > { %v1654_v47 = vpop.eup %1653  ;;  %v1454_v48 = vmul.f32 -1.442695, %v770_v44  ;;  %v820_v49 = vadd.f32 %v1652_v38, %v819_v45 }
 0x1a2   : > { %v1656_v50 = vpop.eup %1655  ;;  %v810_v51 = vadd.f32 1.0, %v1654_v47 }
 0x1a3   : > { %1657 = vpow2.f32 %v1454_v48  ;;  %v824_v53 = vsel %vm823_vm2, %v1652_v38, %v820_v49  ;;  %v832_v54 = vmul.f32 %v1656_v50, %v809_v39  ;;  %vm837_vm4 = vweird.f32 %v1656_v50  ;;  %v1179_v39 = vld [vmem:[#allocation11 + $0xf0] sm:$0xff] }
 0x1a4   : > { %1659 = vrcp.f32 %v810_v51  ;;  %v829_v55 = vsel %vm826_vm3, %v828_v52, %v824_v53  ;;  %vm838_vm6 = vmor %vm836_vm5, %vm837_vm4  ;;  %v857_v62 = vand.u32 2147483648, %v810_v51  ;;  %v855_v12 = vand.u32 2147483647, %v810_v51  ;;  %1187 = vmatpush.msrb.mxu0 %v1179_v39  ;;  %v1159_v39 = vld [vmem:[#allocation11 + $0x50] sm:$0xff] }
 0x1a5   : > { %972 = vmatmul.f32.vlgmr.msrb.gmra.mxu3 %v829_v55  ;;  %v833_v56 = vsub.f32 1.0, %v832_v54  ;;  %vm851_vm9 = vweird.f32 %v810_v51 }
 0x1a6   : > { %v772_v57 = vpop.f32.mrf.mxu2  ;;  %v858_v18 = vor.u32 1.1754944e-38, %v857_v62  ;;  %vm856_vm11 = vcmp.eq.f32.partialorder %v855_v12, 8.507059e+37 }
 0x1a7   : > { %v773_v59 = vadd.f32 %v2229_v24, %v772_v57  ;;  %v834_v60 = vmul.f32 %v1656_v50, %v833_v56 }
 0x1a9   : > { %v1658_v63 = vpop.eup %1657  ;;  %v1455_v0 = vmul.f32 -1.442695, %v773_v59  ;;  %v835_v1 = vadd.f32 %v1656_v50, %v834_v60 }
 0x1aa   : > { %v1660_v2 = vpop.eup %1659  ;;  %v811_v3 = vadd.f32 1.0, %v1658_v63 }
 0x1ab   : > { %1661 = vpow2.f32 %v1455_v0  ;;  %v839_v5 = vsel %vm838_vm6, %v1656_v50, %v835_v1  ;;  %v847_v6 = vmul.f32 %v1660_v2, %v810_v51  ;;  %vm852_vm8 = vweird.f32 %v1660_v2 }
 0x1ac   : > { %1663 = vrcp.f32 %v811_v3  ;;  %v844_v7 = vsel %vm841_vm7, %v843_v4, %v839_v5  ;;  %vm853_vm10 = vmor %vm851_vm9, %vm852_vm8  ;;  %v872_v25 = vand.u32 2147483648, %v811_v3  ;;  %v870_v28 = vand.u32 2147483647, %v811_v3 }
 0x1ad   : > { %975 = vmatmul.f32.gmra.mxu3 %v844_v7  ;;  %v848_v8 = vsub.f32 1.0, %v847_v6  ;;  %vm866_vm13 = vweird.f32 %v811_v3 }
 0x1ae   : > { %v775_v9 = vpop.f32.mrf.mxu2  ;;  %v873_v34 = vor.u32 1.1754944e-38, %v872_v25  ;;  %vm871_vm15 = vcmp.eq.f32.partialorder %v870_v28, 8.507059e+37  ;;  %v1173_v25 = vld [vmem:[#allocation11 + $0xc0] sm:$0xff]  ;;  %v1172_v28 = vld [vmem:[#allocation11 + $0xb8] sm:$0xff] }
 0x1af   : > { %v776_v10 = vadd.f32 %v2229_v24, %v775_v9  ;;  %v849_v11 = vmul.f32 %v1660_v2, %v848_v8 }
 0x1b1   : > { %v1662_v13 = vpop.eup %1661  ;;  %v1456_v14 = vmul.f32 -1.442695, %v776_v10  ;;  %v850_v15 = vadd.f32 %v1660_v2, %v849_v11 }
 0x1b2   : > { %v1664_v16 = vpop.eup %1663  ;;  %v812_v17 = vadd.f32 1.0, %v1662_v13 }
 0x1b3   : > { %1665 = vpow2.f32 %v1456_v14  ;;  %v854_v19 = vsel %vm853_vm10, %v1660_v2, %v850_v15  ;;  %v862_v20 = vmul.f32 %v1664_v16, %v811_v3  ;;  %vm867_vm12 = vweird.f32 %v1664_v16 }
 0x1b4   : > { %1667 = vrcp.f32 %v812_v17  ;;  %v859_v21 = vsel %vm856_vm11, %v858_v18, %v854_v19  ;;  %vm868_vm14 = vmor %vm866_vm13, %vm867_vm12  ;;  %v887_v42 = vand.u32 2147483648, %v812_v17  ;;  %v885_v45 = vand.u32 2147483647, %v812_v17 }
 0x1b5   : > { %978 = vmatmul.f32.gmra.mxu3 %v859_v21  ;;  %v863_v22 = vsub.f32 1.0, %v862_v20  ;;  %vm881_vm1 = vweird.f32 %v812_v17  ;;  %v1177_v20 = vld [vmem:[#allocation11 + $0xe0] sm:$0xff]  ;;  %v1178_v21 = vld [vmem:[#allocation11 + $0xe8] sm:$0xff] }
 0x1b6   : > { %v778_v23 = vpop.f32.mrf.mxu2  ;;  %v888_v51 = vor.u32 1.1754944e-38, %v887_v42  ;;  %vm886_vm3 = vcmp.eq.f32.partialorder %v885_v45, 8.507059e+37  ;;  %1188 = vmatpush.msrb.mxu0 %v1177_v20  ;;  %1229 = vmatpush.msrb.mxu1 %v1178_v21  ;;  %v1158_v42 = vld [vmem:[#allocation11 + $0x48] sm:$0xff]  ;;  %v1153_v45 = vld [vmem:[#allocation11 + $0x20] sm:$0xff] }
 0x1b7   : > { %v779_v26 = vadd.f32 %v2229_v24, %v778_v23  ;;  %v864_v27 = vmul.f32 %v1664_v16, %v863_v22  ;;  %v1175_v22 = vld [vmem:[#allocation11 + $0xd0] sm:$0xff]  ;;  %v1176_v23 = vld [vmem:[#allocation11 + $0xd8] sm:$0xff] }
 0x1b8   : > { %1189 = vmatpush.msrb.mxu0 %v1175_v22  ;;  %1230 = vmatpush.msrb.mxu1 %v1176_v23 }
 0x1b9   : > { %v1666_v29 = vpop.eup %1665  ;;  %v1457_v30 = vmul.f32 -1.442695, %v779_v26  ;;  %v865_v31 = vadd.f32 %v1664_v16, %v864_v27  ;;  %v1174_v26 = vld [vmem:[#allocation11 + $0xc8] sm:$0xff]  ;;  %v1171_v27 = vld [vmem:[#allocation11 + $0xb0] sm:$0xff] }
 0x1ba   : > { %v1668_v32 = vpop.eup %1667  ;;  %v813_v33 = vadd.f32 1.0, %v1666_v29  ;;  %1190 = vmatpush.msrb.mxu0 %v1173_v25  ;;  %1231 = vmatpush.msrb.mxu1 %v1174_v26  ;;  %v1169_v29 = vld [vmem:[#allocation11 + $0xa0] sm:$0xff] }
 0x1bb   : > { %1669 = vpow2.f32 %v1457_v30  ;;  %v869_v35 = vsel %vm868_vm14, %v1664_v16, %v865_v31  ;;  %v877_v36 = vmul.f32 %v1668_v32, %v812_v17  ;;  %vm882_vm0 = vweird.f32 %v1668_v32  ;;  %v1170_v30 = vld [vmem:[#allocation11 + $0xa8] sm:$0xff]  ;;  %v1167_v31 = vld [vmem:[#allocation11 + $0x90] sm:$0xff] }
 0x1bc   : > { %1671 = vrcp.f32 %v813_v33  ;;  %v874_v37 = vsel %vm871_vm15, %v873_v34, %v869_v35  ;;  %vm883_vm2 = vmor %vm881_vm1, %vm882_vm0  ;;  %v900_v57 = vand.u32 2147483647, %v813_v33  ;;  %vm896_vm5 = vweird.f32 %v813_v33  ;;  %1191 = vmatpush.msrb.mxu0 %v1171_v27  ;;  %1232 = vmatpush.msrb.mxu1 %v1172_v28  ;;  %v1166_v34 = vld [vmem:[#allocation11 + $0x88] sm:$0xff]  ;;  %v1163_v35 = vld [vmem:[#allocation11 + $0x70] sm:$0xff] }
 0x1bd   : > { %981 = vmatmul.f32.gmra.mxu3 %v874_v37  ;;  %v878_v38 = vsub.f32 1.0, %v877_v36  ;;  %v1164_v36 = vld [vmem:[#allocation11 + $0x78] sm:$0xff]  ;;  %v1161_v37 = vld [vmem:[#allocation11 + $0x60] sm:$0xff] }
 0x1be   : > { %v781_v41 = vpop.f32.mrf.mxu2  ;;  %vm901_vm7 = vcmp.eq.f32.partialorder %v900_v57, 8.507059e+37  ;;  %1192 = vmatpush.msrb.mxu0 %v1169_v29  ;;  %1233 = vmatpush.msrb.mxu1 %v1170_v30 }
 0x1bf   : > { %v782_v43 = vadd.f32 %v2229_v24, %v781_v41  ;;  %v879_v44 = vmul.f32 %v1668_v32, %v878_v38  ;;  %v902_v24 = vand.u32 2147483648, %v813_v33  ;;  %v1162_v38 = vld [vmem:[#allocation11 + $0x68] sm:$0xff]  ;;  %v1157_v41 = vld [vmem:[#allocation11 + $0x40] sm:$0xff] }
 0x1c0   : > { %1193 = vmatpush.msrb.mxu0 %v1167_v31 }
 0x1c1   : > { %v1670_v46 = vpop.eup %1669  ;;  %v1458_v47 = vmul.f32 -1.442695, %v782_v43  ;;  %v880_v48 = vadd.f32 %v1668_v32, %v879_v44  ;;  %v903_v63 = vor.u32 1.1754944e-38, %v902_v24  ;;  %v1155_v43 = vld [vmem:[#allocation11 + $0x30] sm:$0xff]  ;;  %v1156_v44 = vld [vmem:[#allocation11 + $0x38] sm:$0xff] }
 0x1c2   : > { %v1672_v49 = vpop.eup %1671  ;;  %v814_v50 = vadd.f32 1.0, %v1670_v46  ;;  %v1154_v46 = vld [vmem:[#allocation11 + $0x28] sm:$0xff] }
 0x1c3   : > { %1673 = vpow2.f32 %v1458_v47  ;;  %v884_v52 = vsel %vm883_vm2, %v1668_v32, %v880_v48  ;;  %v892_v53 = vmul.f32 %v1672_v49, %v813_v33  ;;  %vm897_vm4 = vweird.f32 %v1672_v49  ;;  %v1168_v32 = vld [vmem:[#allocation11 + $0x98] sm:$0xff]  ;;  %v1165_v33 = vld [vmem:[#allocation11 + $0x80] sm:$0xff]  ;;  %v1151_v47 = vld [vmem:[#allocation11 + $0x10] sm:$0xff] }
 0x1c4   : > { %1675 = vrcp.f32 %v814_v50  ;;  %v889_v54 = vsel %vm886_vm3, %v888_v51, %v884_v52  ;;  %vm898_vm6 = vmor %vm896_vm5, %vm897_vm4  ;;  %v917_v4 = vand.u32 2147483648, %v814_v50  ;;  %v915_v6 = vand.u32 2147483647, %v814_v50  ;;  %1234 = vmatpush.msrb.mxu1 %v1168_v32  ;;  %1194 = vmatpush.msrb.mxu0 %v1165_v33  ;;  %v1152_v48 = vld [vmem:[#allocation11 + $0x18] sm:$0xff]  ;;  %v1150_v51 = vld [vmem:[#allocation11 + $0x8] sm:$0xff] }
 0x1c5   : > { %984 = vmatmul.f32.gmra.mxu3 %v889_v54  ;;  %v893_v55 = vsub.f32 1.0, %v892_v53  ;;  %vm911_vm9 = vweird.f32 %v814_v50 }
 0x1c6   : > { %v918_v9 = vor.u32 1.1754944e-38, %v917_v4  ;;  %vm916_vm11 = vcmp.eq.f32.partialorder %v915_v6, 8.507059e+37  ;;  %1235 = vmatpush.msrb.mxu1 %v1166_v34  ;;  %1195 = vmatpush.msrb.mxu0 %v1163_v35 }
 0x1c7   : > { %v894_v56 = vmul.f32 %v1672_v49, %v893_v55 }
 0x1c8   : > { %1236 = vmatpush.msrb.mxu1 %v1164_v36  ;;  %1196 = vmatpush.msrb.mxu0 %v1161_v37 }
 0x1c9   : > { %v1674_v58 = vpop.eup %1673  ;;  %v895_v59 = vadd.f32 %v1672_v49, %v894_v56 }
 0x1ca   : > { %v1676_v60 = vpop.eup %1675  ;;  %v815_v61 = vadd.f32 1.0, %v1674_v58  ;;  %1237 = vmatpush.msrb.mxu1 %v1162_v38  ;;  %1197 = vmatpush.msrb.mxu0 %v1159_v39 }
 0x1cb   : > { %v899_v0 = vsel %vm898_vm6, %v1672_v49, %v895_v59  ;;  %v907_v1 = vmul.f32 %v1676_v60, %v814_v50  ;;  %vm912_vm8 = vweird.f32 %v1676_v60  ;;  %v2242_v49 = vld [vmem:[%s2315_s6] ss:$0 sm:$0xff]  ;;  %v1149_v50 = vld [vmem:[#allocation11] sm:$0xff] }
 0x1cc   : > { %1677 = vrcp.f32 %v815_v61  ;;  %v904_v2 = vsel %vm901_vm7, %v903_v63, %v899_v0  ;;  %vm913_vm10 = vmor %vm911_vm9, %vm912_vm8  ;;  %v932_v13 = vand.u32 2147483648, %v815_v61  ;;  %v930_v15 = vand.u32 2147483647, %v815_v61  ;;  %1238 = vmatpush.msrb.mxu1 %v1160_v40  ;;  %1198 = vmatpush.msrb.mxu0 %v1157_v41 }
 0x1cd   : > { %987 = vmatmul.f32.gmra.mxu3 %v904_v2  ;;  %v908_v3 = vsub.f32 1.0, %v907_v1  ;;  %vm926_vm13 = vweird.f32 %v815_v61 }
 0x1ce   : > { %v933_v17 = vor.u32 1.1754944e-38, %v932_v13  ;;  %vm931_vm15 = vcmp.eq.f32.partialorder %v930_v15, 8.507059e+37  ;;  %1239 = vmatpush.msrb.mxu1 %v1158_v42  ;;  %1199 = vmatpush.msrb.mxu0 %v1155_v43 }
 0x1cf   : > { %v909_v5 = vmul.f32 %v1676_v60, %v908_v3 }
 0x1d0   : > { %1240 = vmatpush.msrb.mxu1 %v1156_v44  ;;  %1200 = vmatpush.msrb.mxu0 %v1153_v45 }
 0x1d1   : > { %v910_v7 = vadd.f32 %v1676_v60, %v909_v5 }
 0x1d2   : > { %v1678_v8 = vpop.eup %1677  ;;  %1241 = vmatpush.msrb.mxu1 %v1154_v46  ;;  %1201 = vmatpush.msrb.mxu0 %v1151_v47 }
 0x1d3   : > { %v914_v62 = vsel %vm913_vm10, %v1676_v60, %v910_v7  ;;  %v922_v10 = vmul.f32 %v1678_v8, %v815_v61  ;;  %vm927_vm12 = vweird.f32 %v1678_v8 }
 0x1d4   : > { %v919_v11 = vsel %vm916_vm11, %v918_v9, %v914_v62  ;;  %vm928_vm14 = vmor %vm926_vm13, %vm927_vm12  ;;  %1242 = vmatpush.msrb.mxu1 %v1152_v48  ;;  %1202 = vmatpush.msrb.mxu0 %v1149_v50 }
 0x1d5   : > { %990 = vmatmul.f32.gmra.mxu3 %v919_v11  ;;  %v923_v12 = vsub.f32 1.0, %v922_v10 }
 0x1d6   : > { %1243 = vmatpush.msrb.mxu1 %v1150_v51 }
 0x1d7   : > { %v924_v14 = vmul.f32 %v1678_v8, %v923_v12 }
 0x1d9   : > { %v925_v16 = vadd.f32 %v1678_v8, %v924_v14 }
 0x1db   : > { %v929_v18 = vsel %vm928_vm14, %v1678_v8, %v925_v16 }
 0x1dc   : > { %v934_v19 = vsel %vm931_vm15, %v933_v17, %v929_v18 }
 0x1dd   : > { %993 = vmatmul.f32.gmra.mxu3 %v934_v19 }
 0x228   : > { %v973_v52 = vpop.f32.mrf.mxu3 }
 0x229   : > { %v974_v53 = vadd.f32 %v2242_v49, %v973_v52 }
 0x22b   : > { %v1459_v54 = vmul.f32 -1.442695, %v974_v53 }
 0x22d   : > { %1679 = vpow2.f32 %v1459_v54 }
 0x230   : > { %v976_v55 = vpop.f32.mrf.mxu3 }
 0x231   : > { %v977_v24 = vadd.f32 %v2242_v49, %v976_v55 }
 0x233   : > { %v1680_v56 = vpop.eup %1679  ;;  %v1460_v57 = vmul.f32 -1.442695, %v977_v24 }
 0x234   : > { %v1021_v58 = vadd.f32 1.0, %v1680_v56 }
 0x235   : > { %1681 = vpow2.f32 %v1460_v57 }
 0x236   : > { %1683 = vrcp.f32 %v1021_v58  ;;  %v1040_v5 = vand.u32 2147483648, %v1021_v58  ;;  %v1038_v8 = vand.u32 2147483647, %v1021_v58  ;;  %vm1034_vm1 = vweird.f32 %v1021_v58 }
 0x238   : > { %v979_v59 = vpop.f32.mrf.mxu3  ;;  %v1041_v13 = vor.u32 1.1754944e-38, %v1040_v5  ;;  %vm1039_vm3 = vcmp.eq.f32.partialorder %v1038_v8, 8.507059e+37 }
 0x239   : > { %v980_v60 = vadd.f32 %v2242_v49, %v979_v59 }
 0x23b   : > { %v1682_v61 = vpop.eup %1681  ;;  %v1461_v63 = vmul.f32 -1.442695, %v980_v60 }
 0x23c   : > { %v1684_v0 = vpop.eup %1683  ;;  %v1022_v1 = vadd.f32 1.0, %v1682_v61 }
 0x23d   : > { %1685 = vpow2.f32 %v1461_v63  ;;  %v1030_v2 = vmul.f32 %v1684_v0, %v1021_v58  ;;  %vm1035_vm0 = vweird.f32 %v1684_v0 }
 0x23e   : > { %1687 = vrcp.f32 %v1022_v1  ;;  %vm1036_vm2 = vmor %vm1034_vm1, %vm1035_vm0  ;;  %v1055_v19 = vand.u32 2147483648, %v1022_v1  ;;  %v1053_v22 = vand.u32 2147483647, %v1022_v1  ;;  %vm1049_vm5 = vweird.f32 %v1022_v1 }
 0x23f   : > { %v1031_v3 = vsub.f32 1.0, %v1030_v2 }
 0x240   : > { %v982_v4 = vpop.f32.mrf.mxu3  ;;  %v1056_v29 = vor.u32 1.1754944e-38, %v1055_v19  ;;  %vm1054_vm7 = vcmp.eq.f32.partialorder %v1053_v22, 8.507059e+37 }
 0x241   : > { %v983_v6 = vadd.f32 %v2242_v49, %v982_v4  ;;  %v1032_v7 = vmul.f32 %v1684_v0, %v1031_v3 }
 0x243   : > { %v1686_v9 = vpop.eup %1685  ;;  %v1462_v62 = vmul.f32 -1.442695, %v983_v6  ;;  %v1033_v10 = vadd.f32 %v1684_v0, %v1032_v7 }
 0x244   : > { %v1688_v11 = vpop.eup %1687  ;;  %v1023_v12 = vadd.f32 1.0, %v1686_v9 }
 0x245   : > { %1689 = vpow2.f32 %v1462_v62  ;;  %v1037_v14 = vsel %vm1036_vm2, %v1684_v0, %v1033_v10  ;;  %v1045_v15 = vmul.f32 %v1688_v11, %v1022_v1  ;;  %vm1050_vm4 = vweird.f32 %v1688_v11 }
 0x246   : > { %1691 = vrcp.f32 %v1023_v12  ;;  %v1042_v16 = vsel %vm1039_vm3, %v1041_v13, %v1037_v14  ;;  %vm1051_vm6 = vmor %vm1049_vm5, %vm1050_vm4  ;;  %v1070_v35 = vand.u32 2147483648, %v1023_v12  ;;  %v1068_v38 = vand.u32 2147483647, %v1023_v12 }
 0x247   : > { %1203 = vmatmul.f32.vlgmr.msrb.gmra.mxu0 %v1042_v16  ;;  %1244 = vmatmul.f32.vlgmr.msrb.gmra.mxu1 %v1042_v16  ;;  %v1046_v17 = vsub.f32 1.0, %v1045_v15  ;;  %vm1064_vm9 = vweird.f32 %v1023_v12 }
 0x248   : > { %v985_v18 = vpop.f32.mrf.mxu3  ;;  %v1071_v44 = vor.u32 1.1754944e-38, %v1070_v35  ;;  %vm1069_vm11 = vcmp.eq.f32.partialorder %v1068_v38, 8.507059e+37 }
 0x249   : > { %v986_v20 = vadd.f32 %v2242_v49, %v985_v18  ;;  %v1047_v21 = vmul.f32 %v1688_v11, %v1046_v17 }
 0x24b   : > { %v1690_v23 = vpop.eup %1689  ;;  %v1463_v25 = vmul.f32 -1.442695, %v986_v20  ;;  %v1048_v26 = vadd.f32 %v1688_v11, %v1047_v21 }
 0x24c   : > { %v1692_v27 = vpop.eup %1691  ;;  %v1024_v28 = vadd.f32 1.0, %v1690_v23 }
 0x24d   : > { %1693 = vpow2.f32 %v1463_v25  ;;  %v1052_v30 = vsel %vm1051_vm6, %v1688_v11, %v1048_v26  ;;  %v1060_v31 = vmul.f32 %v1692_v27, %v1023_v12  ;;  %vm1065_vm8 = vweird.f32 %v1692_v27 }
 0x24e   : > { %1695 = vrcp.f32 %v1024_v28  ;;  %v1057_v32 = vsel %vm1054_vm7, %v1056_v29, %v1052_v30  ;;  %vm1066_vm10 = vmor %vm1064_vm9, %vm1065_vm8  ;;  %v1085_v51 = vand.u32 2147483648, %v1024_v28  ;;  %v1083_v54 = vand.u32 2147483647, %v1024_v28 }
 0x24f   : > { %1206 = vmatmul.f32.gmra.mxu0 %v1057_v32  ;;  %1247 = vmatmul.f32.gmra.mxu1 %v1057_v32  ;;  %v1061_v33 = vsub.f32 1.0, %v1060_v31  ;;  %vm1079_vm13 = vweird.f32 %v1024_v28 }
 0x250   : > { %v988_v34 = vpop.f32.mrf.mxu3  ;;  %v1086_v59 = vor.u32 1.1754944e-38, %v1085_v51  ;;  %vm1084_vm15 = vcmp.eq.f32.partialorder %v1083_v54, 8.507059e+37 }
 0x251   : > { %v989_v36 = vadd.f32 %v2242_v49, %v988_v34  ;;  %v1062_v37 = vmul.f32 %v1692_v27, %v1061_v33 }
 0x253   : > { %v1694_v39 = vpop.eup %1693  ;;  %v1464_v40 = vmul.f32 -1.442695, %v989_v36  ;;  %v1063_v41 = vadd.f32 %v1692_v27, %v1062_v37 }
 0x254   : > { %v1696_v42 = vpop.eup %1695  ;;  %v1025_v43 = vadd.f32 1.0, %v1694_v39 }
 0x255   : > { %1697 = vpow2.f32 %v1464_v40  ;;  %v1067_v45 = vsel %vm1066_vm10, %v1692_v27, %v1063_v41  ;;  %v1075_v46 = vmul.f32 %v1696_v42, %v1024_v28  ;;  %vm1080_vm12 = vweird.f32 %v1696_v42 }
 0x256   : > { %1699 = vrcp.f32 %v1025_v43  ;;  %v1072_v47 = vsel %vm1069_vm11, %v1071_v44, %v1067_v45  ;;  %vm1081_vm14 = vmor %vm1079_vm13, %vm1080_vm12  ;;  %v1100_v2 = vand.u32 2147483648, %v1025_v43  ;;  %v1098_v5 = vand.u32 2147483647, %v1025_v43  ;;  %v1181_v44 = vld [vmem:[%s2317_s8] sm:$0x3] }
 0x257   : > { %1209 = vmatmul.f32.gmra.mxu0 %v1072_v47  ;;  %1250 = vmatmul.f32.gmra.mxu1 %v1072_v47  ;;  %v1076_v48 = vsub.f32 1.0, %v1075_v46  ;;  %vm1094_vm1 = vweird.f32 %v1025_v43  ;;  %v1183_v45 = vperm.slane %v1181_v44, 0  ;;  %v1184_v46 = vperm.slane %v1181_v44, 1 }
 0x258   : > { %v991_v50 = vpop.f32.mrf.mxu3  ;;  %v1101_v10 = vor.u32 1.1754944e-38, %v1100_v2  ;;  %vm1099_vm3 = vcmp.eq.f32.partialorder %v1098_v5, 8.507059e+37 }
 0x259   : > { %v992_v52 = vadd.f32 %v2242_v49, %v991_v50  ;;  %v1077_v53 = vmul.f32 %v1696_v42, %v1076_v48 }
 0x25b   : > { %v1698_v55 = vpop.eup %1697  ;;  %v1465_v24 = vmul.f32 -1.442695, %v992_v52  ;;  %v1078_v56 = vadd.f32 %v1696_v42, %v1077_v53 }
 0x25c   : > { %v1700_v57 = vpop.eup %1699  ;;  %v1026_v58 = vadd.f32 1.0, %v1698_v55 }
 0x25d   : > { %1701 = vpow2.f32 %v1465_v24  ;;  %v1082_v60 = vsel %vm1081_vm14, %v1696_v42, %v1078_v56  ;;  %v1090_v61 = vmul.f32 %v1700_v57, %v1025_v43  ;;  %vm1095_vm0 = vweird.f32 %v1700_v57 }
 0x25e   : > { %1703 = vrcp.f32 %v1026_v58  ;;  %v1087_v63 = vsel %vm1084_vm15, %v1086_v59, %v1082_v60  ;;  %vm1096_vm2 = vmor %vm1094_vm1, %vm1095_vm0  ;;  %v1115_v14 = vand.u32 2147483648, %v1026_v58  ;;  %v1113_v16 = vand.u32 2147483647, %v1026_v58 }
 0x25f   : > { %1212 = vmatmul.f32.gmra.mxu0 %v1087_v63  ;;  %1253 = vmatmul.f32.gmra.mxu1 %v1087_v63  ;;  %v1091_v0 = vsub.f32 1.0, %v1090_v61  ;;  %vm1109_vm5 = vweird.f32 %v1026_v58 }
 0x260   : > { %v994_v1 = vpop.f32.mrf.mxu3  ;;  %v1116_v21 = vor.u32 1.1754944e-38, %v1115_v14  ;;  %vm1114_vm7 = vcmp.eq.f32.partialorder %v1113_v16, 8.507059e+37 }
 0x261   : > { %v995_v3 = vadd.f32 %v2242_v49, %v994_v1  ;;  %v1092_v4 = vmul.f32 %v1700_v57, %v1091_v0 }
 0x263   : > { %v1702_v6 = vpop.eup %1701  ;;  %v1466_v7 = vmul.f32 -1.442695, %v995_v3  ;;  %v1093_v8 = vadd.f32 %v1700_v57, %v1092_v4 }
 0x264   : > { %v1704_v9 = vpop.eup %1703  ;;  %v1027_v62 = vadd.f32 1.0, %v1702_v6 }
 0x265   : > { %1705 = vpow2.f32 %v1466_v7  ;;  %v1097_v11 = vsel %vm1096_vm2, %v1700_v57, %v1093_v8  ;;  %v1105_v12 = vmul.f32 %v1704_v9, %v1026_v58  ;;  %vm1110_vm4 = vweird.f32 %v1704_v9 }
 0x266   : > { %1707 = vrcp.f32 %v1027_v62  ;;  %v1102_v13 = vsel %vm1099_vm3, %v1101_v10, %v1097_v11  ;;  %vm1111_vm6 = vmor %vm1109_vm5, %vm1110_vm4  ;;  %v1130_v27 = vand.u32 2147483648, %v1027_v62  ;;  %v1128_v29 = vand.u32 2147483647, %v1027_v62 }
 0x267   : > { %1215 = vmatmul.f32.gmra.mxu0 %v1102_v13  ;;  %1256 = vmatmul.f32.gmra.mxu1 %v1102_v13  ;;  %v1106_v49 = vsub.f32 1.0, %v1105_v12  ;;  %vm1124_vm9 = vweird.f32 %v1027_v62 }
 0x268   : > { %v1131_v32 = vor.u32 1.1754944e-38, %v1130_v27  ;;  %vm1129_vm11 = vcmp.eq.f32.partialorder %v1128_v29, 8.507059e+37 }
 0x269   : > { %v1107_v15 = vmul.f32 %v1704_v9, %v1106_v49 }
 0x26b   : > { %v1706_v17 = vpop.eup %1705  ;;  %v1108_v18 = vadd.f32 %v1704_v9, %v1107_v15 }
 0x26c   : > { %v1708_v19 = vpop.eup %1707  ;;  %v1028_v20 = vadd.f32 1.0, %v1706_v17 }
 0x26d   : > { %v1112_v22 = vsel %vm1111_vm6, %v1704_v9, %v1108_v18  ;;  %v1120_v23 = vmul.f32 %v1708_v19, %v1027_v62  ;;  %vm1125_vm8 = vweird.f32 %v1708_v19 }
 0x26e   : > { %1709 = vrcp.f32 %v1028_v20  ;;  %v1117_v25 = vsel %vm1114_vm7, %v1116_v21, %v1112_v22  ;;  %vm1126_vm10 = vmor %vm1124_vm9, %vm1125_vm8  ;;  %v1145_v37 = vand.u32 2147483648, %v1028_v20  ;;  %v1143_v39 = vand.u32 2147483647, %v1028_v20 }
 0x26f   : > { %1218 = vmatmul.f32.gmra.mxu0 %v1117_v25  ;;  %1259 = vmatmul.f32.gmra.mxu1 %v1117_v25  ;;  %v1121_v26 = vsub.f32 1.0, %v1120_v23  ;;  %vm1139_vm13 = vweird.f32 %v1028_v20 }
 0x270   : > { %v1146_v41 = vor.u32 1.1754944e-38, %v1145_v37  ;;  %vm1144_vm15 = vcmp.eq.f32.partialorder %v1143_v39, 8.507059e+37 }
 0x271   : > { %v1122_v28 = vmul.f32 %v1708_v19, %v1121_v26 }
 0x273   : > { %v1123_v30 = vadd.f32 %v1708_v19, %v1122_v28 }
 0x274   : > { %v1710_v31 = vpop.eup %1709 }
 0x275   : > { %v1127_v33 = vsel %vm1126_vm10, %v1708_v19, %v1123_v30  ;;  %v1135_v34 = vmul.f32 %v1710_v31, %v1028_v20  ;;  %vm1140_vm12 = vweird.f32 %v1710_v31 }
 0x276   : > { %v1132_v35 = vsel %vm1129_vm11, %v1131_v32, %v1127_v33  ;;  %vm1141_vm14 = vmor %vm1139_vm13, %vm1140_vm12 }
 0x277   : > { %1221 = vmatmul.f32.gmra.mxu0 %v1132_v35  ;;  %1262 = vmatmul.f32.gmra.mxu1 %v1132_v35  ;;  %v1136_v36 = vsub.f32 1.0, %v1135_v34 }
 0x279   : > { %v1137_v38 = vmul.f32 %v1710_v31, %v1136_v36 }
 0x27b   : > { %v1138_v40 = vadd.f32 %v1710_v31, %v1137_v38 }
 0x27d   : > { %v1142_v42 = vsel %vm1141_vm14, %v1710_v31, %v1138_v40 }
 0x27e   : > { %v1147_v43 = vsel %vm1144_vm15, %v1146_v41, %v1142_v42 }
 0x27f   : > { %1224 = vmatmul.f32.gmra.mxu0 %v1147_v43  ;;  %1265 = vmatmul.f32.gmra.mxu1 %v1147_v43 }
 0x2c4   : > { %v1204_v47 = vpop.f32.mrf.mxu0  ;;  %v1245_v48 = vpop.f32.mrf.mxu1 }
 0x2c5   : > { %v1205_v50 = vadd.f32 %v1204_v47, %v1183_v45  ;;  %v1246_v51 = vadd.f32 %v1245_v48, %v1184_v46 }
 0x2c7   : > { %1269 = vst [vmem:[%s2257_s22] sm:$0xff] %v1205_v50 }
 0x2c8   : > { %1270 = vst [vmem:[%s2257_s22 + $0x8] sm:$0xff] %v1246_v51 }
 0x2cc   : > { %v1207_v52 = vpop.f32.mrf.mxu0  ;;  %v1248_v53 = vpop.f32.mrf.mxu1 }
 0x2cd   : > { %v1208_v54 = vadd.f32 %v1207_v52, %v1183_v45  ;;  %v1249_v55 = vadd.f32 %v1248_v53, %v1184_v46 }
 0x2cf   : > { %1271 = vst [vmem:[%s2257_s22 + $0x10] sm:$0xff] %v1208_v54 }
 0x2d0   : > { %1272 = vst [vmem:[%s2257_s22 + $0x18] sm:$0xff] %v1249_v55 }
 0x2d4   : > { %v1210_v24 = vpop.f32.mrf.mxu0  ;;  %v1251_v56 = vpop.f32.mrf.mxu1 }
 0x2d5   : > { %v1211_v57 = vadd.f32 %v1210_v24, %v1183_v45  ;;  %v1252_v58 = vadd.f32 %v1251_v56, %v1184_v46 }
 0x2d7   : > { %1273 = vst [vmem:[%s2257_s22 + $0x20] sm:$0xff] %v1211_v57 }
 0x2d8   : > { %1274 = vst [vmem:[%s2257_s22 + $0x28] sm:$0xff] %v1252_v58 }
 0x2dc   : > { %v1213_v59 = vpop.f32.mrf.mxu0  ;;  %v1254_v60 = vpop.f32.mrf.mxu1 }
 0x2dd   : > { %v1214_v61 = vadd.f32 %v1213_v59, %v1183_v45  ;;  %v1255_v63 = vadd.f32 %v1254_v60, %v1184_v46 }
 0x2df   : > { %1275 = vst [vmem:[%s2257_s22 + $0x30] sm:$0xff] %v1214_v61 }
 0x2e0   : > { %1276 = vst [vmem:[%s2257_s22 + $0x38] sm:$0xff] %v1255_v63 }
 0x2e4   : > { %v1216_v0 = vpop.f32.mrf.mxu0  ;;  %v1257_v1 = vpop.f32.mrf.mxu1 }
 0x2e5   : > { %v1217_v2 = vadd.f32 %v1216_v0, %v1183_v45  ;;  %v1258_v3 = vadd.f32 %v1257_v1, %v1184_v46 }
 0x2e7   : > { %1277 = vst [vmem:[%s2257_s22 + $0x40] sm:$0xff] %v1217_v2 }
 0x2e8   : > { %1278 = vst [vmem:[%s2257_s22 + $0x48] sm:$0xff] %v1258_v3 }
 0x2ec   : > { %v1219_v4 = vpop.f32.mrf.mxu0  ;;  %v1260_v5 = vpop.f32.mrf.mxu1 }
 0x2ed   : > { %v1220_v6 = vadd.f32 %v1219_v4, %v1183_v45  ;;  %v1261_v7 = vadd.f32 %v1260_v5, %v1184_v46 }
 0x2ef   : > { %1279 = vst [vmem:[%s2257_s22 + $0x50] sm:$0xff] %v1220_v6 }
 0x2f0   : > { %1280 = vst [vmem:[%s2257_s22 + $0x58] sm:$0xff] %v1261_v7 }
 0x2f4   : > { %v1222_v8 = vpop.f32.mrf.mxu0  ;;  %v1263_v9 = vpop.f32.mrf.mxu1 }
 0x2f5   : > { %v1223_v62 = vadd.f32 %v1222_v8, %v1183_v45  ;;  %v1264_v10 = vadd.f32 %v1263_v9, %v1184_v46 }
 0x2f7   : > { %1281 = vst [vmem:[%s2257_s22 + $0x60] sm:$0xff] %v1223_v62 }
 0x2f8   : > { %1282 = vst [vmem:[%s2257_s22 + $0x68] sm:$0xff] %v1264_v10 }
 0x2fc   : > { %v1225_v11 = vpop.f32.mrf.mxu0  ;;  %v1266_v12 = vpop.f32.mrf.mxu1 }
 0x2fd   : > { %v1226_v13 = vadd.f32 %v1225_v11, %v1183_v45  ;;  %v1267_v49 = vadd.f32 %v1266_v12, %v1184_v46 }
 0x2ff   : > { %1283 = vst [vmem:[%s2257_s22 + $0x70] sm:$0xff] %v1226_v13 }
 0x300   : > { %1284 = vst [vmem:[%s2257_s22 + $0x78] sm:$0xff] %v1267_v49 }
 0x301   : > { %1918 = shalt.err (!%p1915_p9)
}
 0x302   : > { %s1980_s24 = smov 256   ;;  %s1981_s22 = smov 16  }
 0x303   : > { %1531 = dma.vmem_to_hbm [thread:$0]  (%p2121_p13), %s1300_s3, 2048, %s1302_s4, %s1286_s16, %s1980_s24, %s1980_s24, %s1981_s22  }
 0x304 PF: > { %s1316_s27 = sand.u32 1, %s1957_s30   ;;  %p2335_p10 = scmp.ge.s32.totalorder %s1969_s12, 2 }
 0x305   : > { %s1317_s1 = scalar_lea.sflag [#allocation4], %s1316_s27 }
 0x306   : > { %p1554_p11 = pnand %p2335_p10, %p2126_p4 }
 0x308   : > { %p1555_p0 = pneg %p1554_p11 }
 0x30a   : > { %1952 = dma.done.wait (%p1555_p0), %s1317_s1, 2048  }
 0x30b   : > { %1954 = vsyncadd (%p1555_p0), %s1317_s1, 4294965248  ;;  %p25_p2 = scmp.ge.s32.totalorder %s2101_s18, 4   ;;  %s2336_s30 = smov %s1961_s10 }
 0x30c   : > { %s2337_s10 = smov %s1965_s11  ;;  %s2338_s11 = smov %s2113_s13 }
 0x30d   : > { %s2339_s12 = smov %s2101_s18  ;;  %27 = sbr.rel (!%p25_p2) target bundleno = 12 (0xc), region = 121 }
 0x312   :  { %1323 = vsyncpa [#allocation3], 1 }
 0x313   :  { %1325 = vsyncpa [#allocation3 + $0x1], 1 }
 0x314   :  { %1326 = vsyncpa [#allocation6], 1 }
 0x315   :  { %1327 = vsyncpa [#allocation9], 1 }
 0x316   :  { %1328 = vsyncpa [#allocation12], 1 }
 0x317   :  { %1329 = vsyncpa [#allocation4], 1 }
 0x318   :  { %1331 = vsyncpa [#allocation4 + $0x1], 1 }

</bundles_post_ra>
